<compile_context>
chip_gen: v7x
topology: tpu7x:2x2x1
jax: 0.10.0
libtpu: 0.0.40
codegen_flags: <defaults>
</compile_context>

<pallas_src>
import functools

import jax
import jax.numpy as jnp
from jax.experimental import pallas as pl
from jax.experimental.pallas import tpu as pltpu


def _conv_relu_kernel(x_ref, w_ref, b_ref, o_ref, *scratch,
                      k, s, p, h_out, w_out, is_act):
    # x_ref: (H, W, C_in)            one (squeezed) batch element, unpadded
    # w_ref: (k*k, C_in, TILE_CO)    weights, tap-major
    # b_ref: (1, TILE_CO)
    # o_ref: (h_out*w_out, TILE_CO)
    # scratch[0] (only if p > 0): (H+2p, W+2p, C_in) zero-padded staging buffer
    h_in, w_in, c_in = x_ref.shape

    if p > 0:
        xp_ref = scratch[0]
        xp_ref[...] = jnp.zeros_like(xp_ref)                      # zero border
        xp_ref[pl.ds(p, h_in), pl.ds(p, w_in), :] = x_ref[...]    # interior copy (VMEM only)
        src = xp_ref
    else:
        src = x_ref

    stride = None if s == 1 else s
    hw = h_out * w_out
    acc = jnp.zeros((hw, o_ref.shape[1]), jnp.float32)

    # Static k*k unrolled tap loop: each tap is a unit-stride (for s == 1) window
    # whose lane dim (C_in) is untouched; the reshape only merges leading dims, and
    # the contraction over C_in runs on the MXU with f32 accumulation.
    for ki in range(k):
        for kj in range(k):
            win = src[pl.ds(ki, h_out, stride=stride),
                      pl.ds(kj, w_out, stride=stride), :]          # (h_out, w_out, C_in)
            x_mat = win.reshape(hw, c_in)                          # lane dim unchanged
            acc = acc + jnp.dot(x_mat, w_ref[ki * k + kj],
                                preferred_element_type=jnp.float32)

    y = acc + b_ref[...].astype(jnp.float32)
    if is_act:
        y = jnp.maximum(y, 0.0)
    o_ref[...] = y.astype(o_ref.dtype)


def conv2d_relu_nhwc(x_nhwc, w_oihw, b, *, stride=1, padding=0, is_act=True,
                     tile_co=128):
    """Conv2d(+ReLU) on NHWC activations with PyTorch OIHW weights. No layout glue."""
    N, H, W, C_in = x_nhwc.shape
    C_out, C_in_w, k, k2 = w_oihw.shape
    assert C_in_w == C_in and k == k2, "weight shape mismatch"
    s, p = int(stride), int(padding)
    h_out = (H + 2 * p - k) // s + 1
    w_out = (W + 2 * p - k) // s + 1
    hw = h_out * w_out

    # Weights OIHW -> (k*k, C_in, C_out); tiny tensor, negligible cost.
    w_kkio = jnp.transpose(w_oihw, (2, 3, 1, 0)).reshape(k * k, C_in, C_out)
    b2 = b.reshape(1, C_out)

    tile_co = min(int(tile_co), C_out)
    if C_out % tile_co != 0:
        tile_co = C_out
    n_co = C_out // tile_co

    Hp, Wp = H + 2 * p, W + 2 * p
    itemsize = jnp.dtype(x_nhwc.dtype).itemsize

    scratch_shapes = []
    if p > 0:
        scratch_shapes.append(pltpu.VMEM((Hp, Wp, C_in), x_nhwc.dtype))

    kern = functools.partial(_conv_relu_kernel, k=k, s=s, p=p,
                             h_out=h_out, w_out=w_out, is_act=is_act)

    # Per-generation-safe VMEM budget (v7x only has 64 MiB physical).
    block_bytes = (H * W * C_in + k * k * C_in * tile_co + tile_co
                   + hw * tile_co) * itemsize
    needed = 2 * block_bytes + (Hp * Wp * C_in * itemsize if p > 0 else 0) + (4 << 20)
    vmem_limit = int(min(48 << 20, max(32 << 20, needed)))

    flops = 2 * N * hw * C_out * C_in * k * k
    bytes_accessed = int((x_nhwc.size + w_kkio.size + b2.size + N * hw * C_out) * itemsize)

    out_flat = pl.pallas_call(
        kern,
        out_shape=jax.ShapeDtypeStruct((N, hw, C_out), x_nhwc.dtype),
        grid_spec=pltpu.PrefetchScalarGridSpec(
            num_scalar_prefetch=0,
            grid=(N, n_co),
            # TODO(synk): add H-tiling with a manual halo DMA (memory_space=pl.ANY)
            # for very large feature maps; with grid=(N, C_out-tiles) each step
            # stages one full image in VMEM.
            in_specs=[
                pl.BlockSpec((None, H, W, C_in), lambda n, co: (n, 0, 0, 0)),
                pl.BlockSpec((k * k, C_in, tile_co), lambda n, co: (0, 0, co)),
                pl.BlockSpec((1, tile_co), lambda n, co: (0, co)),
            ],
            out_specs=pl.BlockSpec((None, hw, tile_co), lambda n, co: (n, 0, co)),
            scratch_shapes=scratch_shapes,
        ),
        compiler_params=pltpu.CompilerParams(
            dimension_semantics=("parallel", "parallel"),
            vmem_limit_bytes=vmem_limit),
        cost_estimate=pl.CostEstimate(
            flops=flops, transcendentals=0, bytes_accessed=bytes_accessed),
    )(x_nhwc, w_kkio, b2)

    # Free (layout-preserving) reshape back to NHWC: (N, hw, C_out) -> (N, h, w, C_out).
    return out_flat.reshape(N, h_out, w_out, C_out)


def conv2d_relu_nchw(x_nchw, w_oihw, b, *, stride=1, padding=0, is_act=True):
    """PyTorch-parity adapter: NCHW in/out (conversions only at this boundary)."""
    x_nhwc = jnp.transpose(x_nchw, (0, 2, 3, 1))
    out_nhwc = conv2d_relu_nhwc(x_nhwc, w_oihw, b, stride=stride,
                                padding=padding, is_act=is_act)
    return jnp.transpose(out_nhwc, (0, 3, 1, 2))


if __name__ == "__main__":
    key = jax.random.PRNGKey(0)
    k_x, k_w, k_b = jax.random.split(key, 3)

    # VGG-style conv: 3x3, stride 1, pad 1, with ReLU.
    N, C_in, H, W = 2, 4, 16, 16
    C_out, k, s, p = 8, 3, 1, 1
    x = jax.random.normal(k_x, (N, C_in, H, W), dtype=jnp.float32)          # NCHW
    w = jax.random.normal(k_w, (C_out, C_in, k, k), dtype=jnp.float32) * 0.1  # OIHW
    b = jax.random.normal(k_b, (C_out,), dtype=jnp.float32) * 0.1

    out = conv2d_relu_nchw(x, w, b, stride=s, padding=p, is_act=True)
    out = jax.block_until_ready(out)

    # Pure-JAX reference: conv_general_dilated + bias + ReLU (== nn.Conv2d + nn.ReLU).
    ref = jax.lax.conv_general_dilated(
        x, w, window_strides=(s, s), padding=((p, p), (p, p)),
        dimension_numbers=("NCHW", "OIHW", "NCHW"),
        precision=jax.lax.Precision.HIGHEST)
    ref = jnp.maximum(ref + b.reshape(1, C_out, 1, 1), 0.0)

    assert out.shape == (N, C_out, H, W), out.shape
    max_err = float(jnp.max(jnp.abs(out - ref)))
    assert max_err < 1e-2, f"mismatch vs reference conv+relu, max_err={max_err}"
    print("KERNEL_OK")
</pallas_src>

<mosaic_0001>
module attributes {stable_mosaic.version = 11 : i64} {
  func.func @_conv_relu_kernel(%arg0: i32, %arg1: i32, %arg2: memref<1x16x16x4xf32, #tpu.memory_space<vmem>>, %arg3: memref<9x4x8xf32, #tpu.memory_space<vmem>>, %arg4: memref<1x8xf32, #tpu.memory_space<vmem>>, %arg5: memref<1x256x8xf32, #tpu.memory_space<vmem>>, %arg6: memref<18x18x4xf32, #tpu.memory_space<vmem>>) attributes {dimension_semantics = [#tpu.dimension_semantics<parallel>, #tpu.dimension_semantics<parallel>], iteration_bounds = array<i64: 2, 1>, scalar_prefetch = 0 : i64, scratch_operands = 1 : i64, tpu.core_type = #tpu.core_type<tc>, window_params = [{transform_indices = @transform_0, window_bounds = array<i64: 1, 16, 16, 4>}, {transform_indices = @transform_1, window_bounds = array<i64: 9, 4, 8>}, {transform_indices = @transform_2, window_bounds = array<i64: 1, 8>}, {transform_indices = @transform_3, window_bounds = array<i64: 1, 256, 8>}]} {
    %cst = arith.constant 0.000000e+00 : f32
    %0 = vector.broadcast %cst : f32 to vector<18x18x4xf32>
    %c0 = arith.constant 0 : index
    %c0_0 = arith.constant 0 : index
    %c0_1 = arith.constant 0 : index
    %1 = vector.load %arg6[%c0, %c0_0, %c0_1] : memref<18x18x4xf32, #tpu.memory_space<vmem>>, vector<18x18x4xf32>
    tpu.vector_store %arg6[%c0, %c0_0, %c0_1], %0 {strides = array<i32>} : memref<18x18x4xf32, #tpu.memory_space<vmem>>, vector<18x18x4xf32>,
    %c0_2 = arith.constant 0 : index
    %c0_3 = arith.constant 0 : index
    %c0_4 = arith.constant 0 : index
    %c0_5 = arith.constant 0 : index
    %2 = vector.load %arg2[%c0_2, %c0_3, %c0_4, %c0_5] : memref<1x16x16x4xf32, #tpu.memory_space<vmem>>, vector<1x16x16x4xf32>
    %3 = vector.shape_cast %2 : vector<1x16x16x4xf32> to vector<16x16x4xf32>
    %c1 = arith.constant 1 : index
    %c1_6 = arith.constant 1 : index
    %c0_7 = arith.constant 0 : index
    %4 = vector.load %arg6[%c1, %c1_6, %c0_7] : memref<18x18x4xf32, #tpu.memory_space<vmem>>, vector<16x16x4xf32>
    tpu.vector_store %arg6[%c1, %c1_6, %c0_7], %3 {strides = array<i32>} : memref<18x18x4xf32, #tpu.memory_space<vmem>>, vector<16x16x4xf32>,
    %cst_8 = arith.constant 0.000000e+00 : f32
    %5 = vector.broadcast %cst_8 : f32 to vector<256x8xf32>
    %c0_9 = arith.constant 0 : index
    %c0_10 = arith.constant 0 : index
    %c0_11 = arith.constant 0 : index
    %6 = vector.load %arg6[%c0_9, %c0_10, %c0_11] : memref<18x18x4xf32, #tpu.memory_space<vmem>>, vector<16x16x4xf32>
    %7 = vector.shape_cast %6 : vector<16x16x4xf32> to vector<256x4xf32>
    %c0_12 = arith.constant 0 : index
    %c0_13 = arith.constant 0 : index
    %c0_14 = arith.constant 0 : index
    %8 = vector.load %arg3[%c0_12, %c0_13, %c0_14] : memref<9x4x8xf32, #tpu.memory_space<vmem>>, vector<1x4x8xf32>
    %9 = vector.shape_cast %8 : vector<1x4x8xf32> to vector<4x8xf32>
    %cst_15 = arith.constant dense<0.000000e+00> : vector<256x8xf32>
    %10 = tpu.matmul %7, %9, %cst_15 {dimension_numbers = #tpu.dot_dimension_numbers<[1], [0], [0], [1], [0, 0, 1, 1], [], []>} : vector<256x4xf32>, vector<4x8xf32>, vector<256x8xf32> -> vector<256x8xf32>
    %11 = arith.addf %5, %10 : vector<256x8xf32>
    %c0_16 = arith.constant 0 : index
    %c1_17 = arith.constant 1 : index
    %c0_18 = arith.constant 0 : index
    %12 = vector.load %arg6[%c0_16, %c1_17, %c0_18] : memref<18x18x4xf32, #tpu.memory_space<vmem>>, vector<16x16x4xf32>
    %13 = vector.shape_cast %12 : vector<16x16x4xf32> to vector<256x4xf32>
    %c1_19 = arith.constant 1 : index
    %c0_20 = arith.constant 0 : index
    %c0_21 = arith.constant 0 : index
    %14 = vector.load %arg3[%c1_19, %c0_20, %c0_21] : memref<9x4x8xf32, #tpu.memory_space<vmem>>, vector<1x4x8xf32>
    %15 = vector.shape_cast %14 : vector<1x4x8xf32> to vector<4x8xf32>
    %cst_22 = arith.constant dense<0.000000e+00> : vector<256x8xf32>
    %16 = tpu.matmul %13, %15, %cst_22 {dimension_numbers = #tpu.dot_dimension_numbers<[1], [0], [0], [1], [0, 0, 1, 1], [], []>} : vector<256x4xf32>, vector<4x8xf32>, vector<256x8xf32> -> vector<256x8xf32>
    %17 = arith.addf %11, %16 : vector<256x8xf32>
    %c0_23 = arith.constant 0 : index
    %c2 = arith.constant 2 : index
    %c0_24 = arith.constant 0 : index
    %18 = vector.load %arg6[%c0_23, %c2, %c0_24] : memref<18x18x4xf32, #tpu.memory_space<vmem>>, vector<16x16x4xf32>
    %19 = vector.shape_cast %18 : vector<16x16x4xf32> to vector<256x4xf32>
    %c2_25 = arith.constant 2 : index
    %c0_26 = arith.constant 0 : index
    %c0_27 = arith.constant 0 : index
    %20 = vector.load %arg3[%c2_25, %c0_26, %c0_27] : memref<9x4x8xf32, #tpu.memory_space<vmem>>, vector<1x4x8xf32>
    %21 = vector.shape_cast %20 : vector<1x4x8xf32> to vector<4x8xf32>
    %cst_28 = arith.constant dense<0.000000e+00> : vector<256x8xf32>
    %22 = tpu.matmul %19, %21, %cst_28 {dimension_numbers = #tpu.dot_dimension_numbers<[1], [0], [0], [1], [0, 0, 1, 1], [], []>} : vector<256x4xf32>, vector<4x8xf32>, vector<256x8xf32> -> vector<256x8xf32>
    %23 = arith.addf %17, %22 : vector<256x8xf32>
    %c1_29 = arith.constant 1 : index
    %c0_30 = arith.constant 0 : index
    %c0_31 = arith.constant 0 : index
    %24 = vector.load %arg6[%c1_29, %c0_30, %c0_31] : memref<18x18x4xf32, #tpu.memory_space<vmem>>, vector<16x16x4xf32>
    %25 = vector.shape_cast %24 : vector<16x16x4xf32> to vector<256x4xf32>
    %c3 = arith.constant 3 : index
    %c0_32 = arith.constant 0 : index
    %c0_33 = arith.constant 0 : index
    %26 = vector.load %arg3[%c3, %c0_32, %c0_33] : memref<9x4x8xf32, #tpu.memory_space<vmem>>, vector<1x4x8xf32>
    %27 = vector.shape_cast %26 : vector<1x4x8xf32> to vector<4x8xf32>
    %cst_34 = arith.constant dense<0.000000e+00> : vector<256x8xf32>
    %28 = tpu.matmul %25, %27, %cst_34 {dimension_numbers = #tpu.dot_dimension_numbers<[1], [0], [0], [1], [0, 0, 1, 1], [], []>} : vector<256x4xf32>, vector<4x8xf32>, vector<256x8xf32> -> vector<256x8xf32>
    %29 = arith.addf %23, %28 : vector<256x8xf32>
    %c1_35 = arith.constant 1 : index
    %c1_36 = arith.constant 1 : index
    %c0_37 = arith.constant 0 : index
    %30 = vector.load %arg6[%c1_35, %c1_36, %c0_37] : memref<18x18x4xf32, #tpu.memory_space<vmem>>, vector<16x16x4xf32>
    %31 = vector.shape_cast %30 : vector<16x16x4xf32> to vector<256x4xf32>
    %c4 = arith.constant 4 : index
    %c0_38 = arith.constant 0 : index
    %c0_39 = arith.constant 0 : index
    %32 = vector.load %arg3[%c4, %c0_38, %c0_39] : memref<9x4x8xf32, #tpu.memory_space<vmem>>, vector<1x4x8xf32>
    %33 = vector.shape_cast %32 : vector<1x4x8xf32> to vector<4x8xf32>
    %cst_40 = arith.constant dense<0.000000e+00> : vector<256x8xf32>
    %34 = tpu.matmul %31, %33, %cst_40 {dimension_numbers = #tpu.dot_dimension_numbers<[1], [0], [0], [1], [0, 0, 1, 1], [], []>} : vector<256x4xf32>, vector<4x8xf32>, vector<256x8xf32> -> vector<256x8xf32>
    %35 = arith.addf %29, %34 : vector<256x8xf32>
    %c1_41 = arith.constant 1 : index
    %c2_42 = arith.constant 2 : index
    %c0_43 = arith.constant 0 : index
    %36 = vector.load %arg6[%c1_41, %c2_42, %c0_43] : memref<18x18x4xf32, #tpu.memory_space<vmem>>, vector<16x16x4xf32>
    %37 = vector.shape_cast %36 : vector<16x16x4xf32> to vector<256x4xf32>
    %c5 = arith.constant 5 : index
    %c0_44 = arith.constant 0 : index
    %c0_45 = arith.constant 0 : index
    %38 = vector.load %arg3[%c5, %c0_44, %c0_45] : memref<9x4x8xf32, #tpu.memory_space<vmem>>, vector<1x4x8xf32>
    %39 = vector.shape_cast %38 : vector<1x4x8xf32> to vector<4x8xf32>
    %cst_46 = arith.constant dense<0.000000e+00> : vector<256x8xf32>
    %40 = tpu.matmul %37, %39, %cst_46 {dimension_numbers = #tpu.dot_dimension_numbers<[1], [0], [0], [1], [0, 0, 1, 1], [], []>} : vector<256x4xf32>, vector<4x8xf32>, vector<256x8xf32> -> vector<256x8xf32>
    %41 = arith.addf %35, %40 : vector<256x8xf32>
    %c2_47 = arith.constant 2 : index
    %c0_48 = arith.constant 0 : index
    %c0_49 = arith.constant 0 : index
    %42 = vector.load %arg6[%c2_47, %c0_48, %c0_49] : memref<18x18x4xf32, #tpu.memory_space<vmem>>, vector<16x16x4xf32>
    %43 = vector.shape_cast %42 : vector<16x16x4xf32> to vector<256x4xf32>
    %c6 = arith.constant 6 : index
    %c0_50 = arith.constant 0 : index
    %c0_51 = arith.constant 0 : index
    %44 = vector.load %arg3[%c6, %c0_50, %c0_51] : memref<9x4x8xf32, #tpu.memory_space<vmem>>, vector<1x4x8xf32>
    %45 = vector.shape_cast %44 : vector<1x4x8xf32> to vector<4x8xf32>
    %cst_52 = arith.constant dense<0.000000e+00> : vector<256x8xf32>
    %46 = tpu.matmul %43, %45, %cst_52 {dimension_numbers = #tpu.dot_dimension_numbers<[1], [0], [0], [1], [0, 0, 1, 1], [], []>} : vector<256x4xf32>, vector<4x8xf32>, vector<256x8xf32> -> vector<256x8xf32>
    %47 = arith.addf %41, %46 : vector<256x8xf32>
    %c2_53 = arith.constant 2 : index
    %c1_54 = arith.constant 1 : index
    %c0_55 = arith.constant 0 : index
    %48 = vector.load %arg6[%c2_53, %c1_54, %c0_55] : memref<18x18x4xf32, #tpu.memory_space<vmem>>, vector<16x16x4xf32>
    %49 = vector.shape_cast %48 : vector<16x16x4xf32> to vector<256x4xf32>
    %c7 = arith.constant 7 : index
    %c0_56 = arith.constant 0 : index
    %c0_57 = arith.constant 0 : index
    %50 = vector.load %arg3[%c7, %c0_56, %c0_57] : memref<9x4x8xf32, #tpu.memory_space<vmem>>, vector<1x4x8xf32>
    %51 = vector.shape_cast %50 : vector<1x4x8xf32> to vector<4x8xf32>
    %cst_58 = arith.constant dense<0.000000e+00> : vector<256x8xf32>
    %52 = tpu.matmul %49, %51, %cst_58 {dimension_numbers = #tpu.dot_dimension_numbers<[1], [0], [0], [1], [0, 0, 1, 1], [], []>} : vector<256x4xf32>, vector<4x8xf32>, vector<256x8xf32> -> vector<256x8xf32>
    %53 = arith.addf %47, %52 : vector<256x8xf32>
    %c2_59 = arith.constant 2 : index
    %c2_60 = arith.constant 2 : index
    %c0_61 = arith.constant 0 : index
    %54 = vector.load %arg6[%c2_59, %c2_60, %c0_61] : memref<18x18x4xf32, #tpu.memory_space<vmem>>, vector<16x16x4xf32>
    %55 = vector.shape_cast %54 : vector<16x16x4xf32> to vector<256x4xf32>
    %c8 = arith.constant 8 : index
    %c0_62 = arith.constant 0 : index
    %c0_63 = arith.constant 0 : index
    %56 = vector.load %arg3[%c8, %c0_62, %c0_63] : memref<9x4x8xf32, #tpu.memory_space<vmem>>, vector<1x4x8xf32>
    %57 = vector.shape_cast %56 : vector<1x4x8xf32> to vector<4x8xf32>
    %cst_64 = arith.constant dense<0.000000e+00> : vector<256x8xf32>
    %58 = tpu.matmul %55, %57, %cst_64 {dimension_numbers = #tpu.dot_dimension_numbers<[1], [0], [0], [1], [0, 0, 1, 1], [], []>} : vector<256x4xf32>, vector<4x8xf32>, vector<256x8xf32> -> vector<256x8xf32>
    %59 = arith.addf %53, %58 : vector<256x8xf32>
    %c0_65 = arith.constant 0 : index
    %c0_66 = arith.constant 0 : index
    %60 = vector.load %arg4[%c0_65, %c0_66] : memref<1x8xf32, #tpu.memory_space<vmem>>, vector<1x8xf32>
    %61 = vector.broadcast %60 : vector<1x8xf32> to vector<256x8xf32>
    %62 = arith.addf %59, %61 : vector<256x8xf32>
    %cst_67 = arith.constant 0.000000e+00 : f32
    %63 = vector.broadcast %cst_67 : f32 to vector<256x8xf32>
    %64 = arith.maximumf %62, %63 : vector<256x8xf32>
    %c0_68 = arith.constant 0 : index
    %c0_69 = arith.constant 0 : index
    %c0_70 = arith.constant 0 : index
    %65 = vector.load %arg5[%c0_68, %c0_69, %c0_70] : memref<1x256x8xf32, #tpu.memory_space<vmem>>, vector<1x256x8xf32>
    %66 = vector.shape_cast %65 : vector<1x256x8xf32> to vector<256x8xf32>
    %67 = vector.shape_cast %64 : vector<256x8xf32> to vector<1x256x8xf32>
    tpu.vector_store %arg5[%c0_68, %c0_69, %c0_70], %67 {strides = array<i32>} : memref<1x256x8xf32, #tpu.memory_space<vmem>>, vector<1x256x8xf32>,
    return
  }
  func.func @transform_0(%arg0: i32, %arg1: i32) -> (i32, i32, i32, i32) {
    %c0_i32 = arith.constant 0 : i32
    %c0_i32_0 = arith.constant 0 : i32
    %c0_i32_1 = arith.constant 0 : i32
    %c0_i32_2 = arith.constant 0 : i32
    return %arg0, %c0_i32, %c0_i32_0, %c0_i32_1 : i32, i32, i32, i32
  }
  func.func @transform_1(%arg0: i32, %arg1: i32) -> (i32, i32, i32) {
    %c0_i32 = arith.constant 0 : i32
    %c0_i32_0 = arith.constant 0 : i32
    %c0_i32_1 = arith.constant 0 : i32
    return %c0_i32, %c0_i32_0, %arg1 : i32, i32, i32
  }
  func.func @transform_2(%arg0: i32, %arg1: i32) -> (i32, i32) {
    %c0_i32 = arith.constant 0 : i32
    %c0_i32_0 = arith.constant 0 : i32
    return %c0_i32, %arg1 : i32, i32
  }
  func.func @transform_3(%arg0: i32, %arg1: i32) -> (i32, i32, i32) {
    %c0_i32 = arith.constant 0 : i32
    %c0_i32_0 = arith.constant 0 : i32
    return %arg0, %c0_i32, %arg1 : i32, i32, i32
  }
}

</mosaic_0001>

<bundles_post_ra>
// kernel: tpu_custom_call.1
= control target key start
LH: loop header
LB: loop body
LE: loop exit
PB: predicated region body
PF: predicated region fallthrough
CT: control target
= control target key end

     0   :  { %s5395_s12 = smov 0   ;;  %s5397_s13 = smov 0   ;;  %s6503_s0 = inlined_call_operand.vmem [shape: f32[2,16,16,4], index: 0, kind: input, shape index: {}]   ;;  %s6504_s1 = inlined_call_operand.vmem [shape: f32[9,4,8], index: 1, kind: input, shape index: {}]   ;;  %s6505_s2 = inlined_call_operand.vmem [shape: f32[1,8], index: 2, kind: input, shape index: {}]   ;;  %s6506_s3 = inlined_call_operand.vmem [shape: f32[2,256,8], index: 3, kind: output, shape index: {}]  }
   0x1   :  { %s5399_s14 = smov 0  }
   0x2 LB: > { %s25_s15 = sadd.s32 1, %s5368_s13  ;;  %p4005_p0 = scmp.ge.s32.totalorder %s5372_s14, 1  ;;  %s5372_s14 = sphi %s5399_s14, %s13_s14   ;;  %s5368_s13 = sphi %s5397_s13, %s6616_s13   ;;  %s5364_s12 = sphi %s5395_s12, %s6615_s12  }
   0x3   : > { %p27_p1 = scmp.ge.s32.totalorder %s25_s15, 2  ;;  %p168_p2 = scmp.lt.s32.totalorder %s5372_s14, 3 }
   0x5   : > { %s6618_s15 = smov (%p27_p1, %s25_s15), 0  ;;  %p169_p3 = pnand %p4005_p0, %p168_p2 }
   0x7   : > { %172 = sbr.rel (%p169_p3) target bundleno = 555 (0x22b), region = 32 }
   0xe   : > { %v5418_v0 = vld [vmem:[%s6504_s1 + $0x4] sm:$0xf]  ;;  %vm506_vm0 = vcmask 1043456   ;;  %vm222_vm1 = vcmask 31744   ;;  %vm225_vm2 = vcmask 25600   ;;  %v5374_v1 = vmov 0.0  }
   0xf   : > { %4617 = vmatprep.subr.msk.mxu1 %vm506_vm0, %v5418_v0  ;;  %223 = vst.msk [vmem:[#allocation2] sm:$0xff] %vm222_vm1, %v5374_v1  ;;  %224 = vst.msk [vmem:[#allocation2 + $0x8] sm:$0xff] %vm222_vm1, %v5374_v1  ;;  %v5479_v2 = vld [vmem:[%s6504_s1 + $0x10] sm:$0xf]  ;;  %p202_p4 = scmp.lt.s32.totalorder %s5364_s12, 1  ;;  %vm3861_vm3 = vcmask 64512  }
  0x10   : > { %227 = vst.msk [vmem:[#allocation2 + $0x18] sm:$0xff] %vm222_vm1, %v5374_v1  ;;  %228 = vst.msk [vmem:[#allocation2 + $0x20] sm:$0xff] %vm222_vm1, %v5374_v1  ;;  %v375_v3 = vld [vmem:[%s6504_s1] sm:$0xf]  ;;  %4618 = vmatpush3.msk.msra.mxu1 %vm506_vm0, %v5418_v0  ;;  %4817 = vmatprep.subr.msk.mxu0 %vm506_vm0, %v5479_v2  ;;  %v5492_v4 = vld [vmem:[%s6504_s1 + $0x14] sm:$0xf] }
  0x11   : > { %230 = vst.msk [vmem:[#allocation2 + $0x30] sm:$0xff] %vm222_vm1, %v5374_v1  ;;  %231 = vst.msk [vmem:[#allocation2 + $0x38] sm:$0xff] %vm222_vm1, %v5374_v1  ;;  %4818 = vmatpush3.msk.msra.mxu0 %vm506_vm0, %v5479_v2  ;;  %s6620_s12 = smov (!%p202_p4, %s5364_s12), 1  ;;  %4667 = vmatprep.subr.msk.mxu1 %vm506_vm0, %v375_v3  ;;  %v5516_v8 = vld [vmem:[%s6504_s1 + $0x8] sm:$0xf] }
  0x12   : > { %233 = vst.msk [vmem:[#allocation2 + $0x48] sm:$0xff] %vm222_vm1, %v5374_v1  ;;  %234 = vst.msk [vmem:[#allocation2 + $0x50] sm:$0xff] %vm222_vm1, %v5374_v1  ;;  %4867 = vmatprep.subr.msk.mxu0 %vm506_vm0, %v5492_v4  ;;  %s4318_s24 = sshll.u32 %s6620_s12, 8  ;;  %v5571_v33 = vld [vmem:[%s6504_s1 + $0x18] sm:$0xf] }
  0x13   : > { %236 = vst.msk [vmem:[#allocation2 + $0x60] sm:$0xff] %vm222_vm1, %v5374_v1  ;;  %237 = vst.msk [vmem:[#allocation2 + $0x68] sm:$0xff] %vm222_vm1, %v5374_v1  ;;  %s5508_s27 = scalar_lea.vmem %s6503_s0, %s4318_s24  ;;  %v5700_v63 = vld [vmem:[%s6504_s1 + $0x1c] sm:$0xf]  ;;  %s6393_s19 = scalar_lea.vmem %s6506_s3, %s4318_s24 }
  0x14   : > { %239 = vst.msk [vmem:[#allocation2 + $0x78] sm:$0xff] %vm222_vm1, %v5374_v1  ;;  %240 = vst.msk [vmem:[#allocation2 + $0x80] sm:$0xff] %vm222_vm1, %v5374_v1  ;;  %v278_v5 = vld [vmem:[%s5508_s27] sm:$0xff]  ;;  %v279_v6 = vld [vmem:[%s5508_s27 + $0x8] sm:$0xff] }
  0x15   : > { %242 = vst.msk [vmem:[#allocation2 + $0x90] sm:$0xff] %vm222_vm1, %v5374_v1  ;;  %243 = vst.msk [vmem:[#allocation2 + $0x98] sm:$0xff] %vm222_vm1, %v5374_v1  ;;  %v280_v7 = vld [vmem:[%s5508_s27 + $0x10] sm:$0xff]  ;;  %v281_v11 = vld [vmem:[%s5508_s27 + $0x18] sm:$0xff] }
  0x16   : > { %245 = vst.msk [vmem:[#allocation2 + $0xa8] sm:$0xff] %vm222_vm1, %v5374_v1  ;;  %246 = vst.msk [vmem:[#allocation2 + $0xb0] sm:$0xff] %vm222_vm1, %v5374_v1  ;;  %v376_v9 = vld [vmem:[#allocation2 + $0x1] sm:$0xff]  ;;  %v284_v14 = vld [vmem:[%s5508_s27 + $0x30] sm:$0xff] }
  0x17   : > { %248 = vst.msk [vmem:[#allocation2 + $0xc0] sm:$0xff] %vm222_vm1, %v5374_v1  ;;  %249 = vst.msk [vmem:[#allocation2 + $0xc8] sm:$0xff] %vm222_vm1, %v5374_v1  ;;  %4619 = vmatprep.mubr.msk.f32.mxu1 %vm222_vm1, %v376_v9  ;;  %v282_v12 = vld [vmem:[%s5508_s27 + $0x20] sm:$0xff]  ;;  %v283_v13 = vld [vmem:[%s5508_s27 + $0x28] sm:$0xff] }
  0x18   : > { %251 = vst.msk [vmem:[#allocation2 + $0xd8] sm:$0xff] %vm222_vm1, %v5374_v1  ;;  %252 = vst.msk [vmem:[#allocation2 + $0xe0] sm:$0xff] %vm222_vm1, %v5374_v1  ;;  %v285_v15 = vld [vmem:[%s5508_s27 + $0x38] sm:$0xff]  ;;  %v286_v16 = vld [vmem:[%s5508_s27 + $0x40] sm:$0xff] }
  0x19   : > { %254 = vst.msk [vmem:[#allocation2 + $0xf0] sm:$0xff] %vm222_vm1, %v5374_v1  ;;  %255 = vst.msk [vmem:[#allocation2 + $0xf8] sm:$0xff] %vm222_vm1, %v5374_v1  ;;  %v287_v17 = vld [vmem:[%s5508_s27 + $0x48] sm:$0xff]  ;;  %v288_v18 = vld [vmem:[%s5508_s27 + $0x50] sm:$0xff] }
  0x1a   : > { %257 = vst.msk [vmem:[#allocation2 + $0x108] sm:$0xff] %vm222_vm1, %v5374_v1  ;;  %258 = vst.msk [vmem:[#allocation2 + $0x110] sm:$0xff] %vm222_vm1, %v5374_v1  ;;  %v289_v19 = vld [vmem:[%s5508_s27 + $0x58] sm:$0xff]  ;;  %v290_v20 = vld [vmem:[%s5508_s27 + $0x60] sm:$0xff] }
  0x1b   : > { %260 = vst.msk [vmem:[#allocation2 + $0x120] sm:$0xff] %vm222_vm1, %v5374_v1  ;;  %261 = vst.msk [vmem:[#allocation2 + $0x128] sm:$0xff] %vm222_vm1, %v5374_v1  ;;  %v291_v21 = vld [vmem:[%s5508_s27 + $0x68] sm:$0xff]  ;;  %v292_v22 = vld [vmem:[%s5508_s27 + $0x70] sm:$0xff] }
  0x1c   : > { %263 = vst.msk [vmem:[#allocation2 + $0x138] sm:$0xff] %vm222_vm1, %v5374_v1  ;;  %264 = vst.msk [vmem:[#allocation2 + $0x140] sm:$0xff] %vm222_vm1, %v5374_v1  ;;  %v293_v23 = vld [vmem:[%s5508_s27 + $0x78] sm:$0xff]  ;;  %v294_v24 = vld [vmem:[%s5508_s27 + $0x80] sm:$0xff] }
  0x1d   : > { %266 = vst.msk [vmem:[#allocation2 + $0x150] sm:$0xff] %vm222_vm1, %v5374_v1  ;;  %267 = vst.msk [vmem:[#allocation2 + $0x158] sm:$0xff] %vm222_vm1, %v5374_v1  ;;  %v295_v25 = vld [vmem:[%s5508_s27 + $0x88] sm:$0xff]  ;;  %v296_v26 = vld [vmem:[%s5508_s27 + $0x90] sm:$0xff] }
  0x1e   : > { %269 = vst.msk [vmem:[#allocation2 + $0x168] sm:$0xff] %vm222_vm1, %v5374_v1  ;;  %270 = vst.msk [vmem:[#allocation2 + $0x170] sm:$0xff] %vm222_vm1, %v5374_v1  ;;  %v297_v27 = vld [vmem:[%s5508_s27 + $0x98] sm:$0xff]  ;;  %v298_v28 = vld [vmem:[%s5508_s27 + $0xa0] sm:$0xff] }
  0x1f   : > { %272 = vst.msk [vmem:[#allocation2 + $0x180] sm:$0xff] %vm222_vm1, %v5374_v1  ;;  %273 = vst.msk [vmem:[#allocation2 + $0x188] sm:$0xff] %vm222_vm1, %v5374_v1  ;;  %v299_v29 = vld [vmem:[%s5508_s27 + $0xa8] sm:$0xff]  ;;  %v300_v38 = vld [vmem:[%s5508_s27 + $0xb0] sm:$0xff] }
  0x20   : > { %275 = vst.msk [vmem:[#allocation2 + $0x198] sm:$0xff] %vm222_vm1, %v5374_v1  ;;  %276 = vst.msk [vmem:[#allocation2 + $0x1a0] sm:$0xff] %vm222_vm1, %v5374_v1  ;;  %v301_v39 = vld [vmem:[%s5508_s27 + $0xb8] sm:$0xff]  ;;  %v302_v40 = vld [vmem:[%s5508_s27 + $0xc0] sm:$0xff] }
  0x21   : > { %226 = vst.msk [vmem:[#allocation2 + $0x10] sm:$0x3] %vm225_vm2, %v5374_v1  ;;  %229 = vst.msk [vmem:[#allocation2 + $0x28] sm:$0x3] %vm225_vm2, %v5374_v1  ;;  %v303_v42 = vld [vmem:[%s5508_s27 + $0xc8] sm:$0xff]  ;;  %v304_v44 = vld [vmem:[%s5508_s27 + $0xd0] sm:$0xff] }
  0x22   : > { %232 = vst.msk [vmem:[#allocation2 + $0x40] sm:$0x3] %vm225_vm2, %v5374_v1  ;;  %235 = vst.msk [vmem:[#allocation2 + $0x58] sm:$0x3] %vm225_vm2, %v5374_v1  ;;  %v305_v45 = vld [vmem:[%s5508_s27 + $0xd8] sm:$0xff]  ;;  %v306_v46 = vld [vmem:[%s5508_s27 + $0xe0] sm:$0xff] }
  0x23   : > { %238 = vst.msk [vmem:[#allocation2 + $0x70] sm:$0x3] %vm225_vm2, %v5374_v1  ;;  %241 = vst.msk [vmem:[#allocation2 + $0x88] sm:$0x3] %vm225_vm2, %v5374_v1  ;;  %v307_v47 = vld [vmem:[%s5508_s27 + $0xe8] sm:$0xff]  ;;  %v308_v57 = vld [vmem:[%s5508_s27 + $0xf0] sm:$0xff] }
  0x24   : > { %244 = vst.msk [vmem:[#allocation2 + $0xa0] sm:$0x3] %vm225_vm2, %v5374_v1  ;;  %247 = vst.msk [vmem:[#allocation2 + $0xb8] sm:$0x3] %vm225_vm2, %v5374_v1  ;;  %v309_v58 = vld [vmem:[%s5508_s27 + $0xf8] sm:$0xff] }
  0x25   : > { %250 = vst.msk [vmem:[#allocation2 + $0xd0] sm:$0x3] %vm225_vm2, %v5374_v1  ;;  %253 = vst.msk [vmem:[#allocation2 + $0xe8] sm:$0x3] %vm225_vm2, %v5374_v1 }
  0x26   : > { %256 = vst.msk [vmem:[#allocation2 + $0x100] sm:$0x3] %vm225_vm2, %v5374_v1  ;;  %259 = vst.msk [vmem:[#allocation2 + $0x118] sm:$0x3] %vm225_vm2, %v5374_v1 }
  0x27   : > { %262 = vst.msk [vmem:[#allocation2 + $0x130] sm:$0x3] %vm225_vm2, %v5374_v1  ;;  %265 = vst.msk [vmem:[#allocation2 + $0x148] sm:$0x3] %vm225_vm2, %v5374_v1 }
  0x28   : > { %268 = vst.msk [vmem:[#allocation2 + $0x160] sm:$0x3] %vm225_vm2, %v5374_v1  ;;  %271 = vst.msk [vmem:[#allocation2 + $0x178] sm:$0x3] %vm225_vm2, %v5374_v1  ;;  %v377_v10 = vld [vmem:[#allocation2 + $0x9] sm:$0xff] }
  0x29   : > { %274 = vst.msk [vmem:[#allocation2 + $0x190] sm:$0x3] %vm225_vm2, %v5374_v1  ;;  %277 = vst.msk [vmem:[#allocation2 + $0x1a8] sm:$0x3] %vm225_vm2, %v5374_v1  ;;  %4620 = vmatmul.mubr.msk.f32.vlgmr.msra.gmra.mrb[0].mxu1 %vm222_vm1, %v377_v10 }
  0x2a   : > { %311 = vst.msk [vmem:[#allocation2 + $0x19] sm:$0xff] %vm222_vm1, %v278_v5  ;;  %312 = vst.msk [vmem:[#allocation2 + $0x21] sm:$0xff] %vm222_vm1, %v279_v6  ;;  %4668 = vmatpush3.msk.msra.mxu1 %vm506_vm0, %v375_v3 }
  0x2b   : > { %313 = vst.msk [vmem:[#allocation2 + $0x31] sm:$0xff] %vm222_vm1, %v280_v7  ;;  %314 = vst.msk [vmem:[#allocation2 + $0x39] sm:$0xff] %vm222_vm1, %v281_v11  ;;  %4717 = vmatprep.subr.msk.mxu1 %vm506_vm0, %v5516_v8 }
  0x2c   : > { %315 = vst.msk [vmem:[#allocation2 + $0x49] sm:$0xff] %vm222_vm1, %v282_v12  ;;  %316 = vst.msk [vmem:[#allocation2 + $0x51] sm:$0xff] %vm222_vm1, %v283_v13 }
  0x2d   : > { %317 = vst.msk [vmem:[#allocation2 + $0x61] sm:$0xff] %vm222_vm1, %v284_v14  ;;  %318 = vst.msk [vmem:[#allocation2 + $0x69] sm:$0xff] %vm222_vm1, %v285_v15 }
  0x2e   : > { %319 = vst.msk [vmem:[#allocation2 + $0x79] sm:$0xff] %vm222_vm1, %v286_v16  ;;  %320 = vst.msk [vmem:[#allocation2 + $0x81] sm:$0xff] %vm222_vm1, %v287_v17 }
  0x2f   : > { %321 = vst.msk [vmem:[#allocation2 + $0x91] sm:$0xff] %vm222_vm1, %v288_v18  ;;  %322 = vst.msk [vmem:[#allocation2 + $0x99] sm:$0xff] %vm222_vm1, %v289_v19 }
  0x30   : > { %323 = vst.msk [vmem:[#allocation2 + $0xa9] sm:$0xff] %vm222_vm1, %v290_v20  ;;  %324 = vst.msk [vmem:[#allocation2 + $0xb1] sm:$0xff] %vm222_vm1, %v291_v21 }
  0x31   : > { %325 = vst.msk [vmem:[#allocation2 + $0xc1] sm:$0xff] %vm222_vm1, %v292_v22  ;;  %326 = vst.msk [vmem:[#allocation2 + $0xc9] sm:$0xff] %vm222_vm1, %v293_v23  ;;  %v378_v30 = vld [vmem:[#allocation2 + $0x19] sm:$0xff]  ;;  %v379_v31 = vld [vmem:[#allocation2 + $0x21] sm:$0xff] }
  0x32   : > { %327 = vst.msk [vmem:[#allocation2 + $0xd9] sm:$0xff] %vm222_vm1, %v294_v24  ;;  %328 = vst.msk [vmem:[#allocation2 + $0xe1] sm:$0xff] %vm222_vm1, %v295_v25  ;;  %v5561_v32 = vld [vmem:[#allocation2 + $0x31] sm:$0xff]  ;;  %4622 = vmatprep.mubr.msk.f32.mxu1 %vm222_vm1, %v378_v30  ;;  %4819 = vmatprep.mubr.msk.f32.mxu0 %vm222_vm1, %v378_v30  ;;  %v5579_v34 = vld [vmem:[#allocation2 + $0x39] sm:$0xff] }
  0x33   : > { %329 = vst.msk [vmem:[#allocation2 + $0xf1] sm:$0xff] %vm222_vm1, %v296_v26  ;;  %330 = vst.msk [vmem:[#allocation2 + $0xf9] sm:$0xff] %vm222_vm1, %v297_v27  ;;  %4623 = vmatmul.mubr.msk.f32.gmra.mrb[2].mxu1 %vm222_vm1, %v379_v31  ;;  %4820 = vmatmul.mubr.msk.f32.vlgmr.msra.gmra.mrb[0].mxu0 %vm222_vm1, %v379_v31  ;;  %v5583_v35 = vld [vmem:[#allocation2 + $0x49] sm:$0xff]  ;;  %v5595_v36 = vld [vmem:[#allocation2 + $0x51] sm:$0xff] }
  0x34   : > { %331 = vst.msk [vmem:[#allocation2 + $0x109] sm:$0xff] %vm222_vm1, %v298_v28  ;;  %332 = vst.msk [vmem:[#allocation2 + $0x111] sm:$0xff] %vm222_vm1, %v299_v29  ;;  %4868 = vmatpush3.msk.msra.mxu0 %vm506_vm0, %v5492_v4  ;;  %4625 = vmatprep.mubr.msk.f32.mxu1 %vm222_vm1, %v5561_v32  ;;  %v5597_v37 = vld [vmem:[#allocation2 + $0x61] sm:$0xff]  ;;  %v5611_v41 = vld [vmem:[#allocation2 + $0x69] sm:$0xff] }
  0x35   : > { %4822 = vmatprep.mubr.msk.f32.mxu0 %vm222_vm1, %v5561_v32  ;;  %4917 = vmatprep.subr.msk.mxu0 %vm506_vm0, %v5571_v33  ;;  %333 = vst.msk [vmem:[#allocation2 + $0x121] sm:$0xff] %vm222_vm1, %v300_v38  ;;  %334 = vst.msk [vmem:[#allocation2 + $0x129] sm:$0xff] %vm222_vm1, %v301_v39  ;;  %v5616_v43 = vld [vmem:[#allocation2 + $0x79] sm:$0xff]  ;;  %v5634_v48 = vld [vmem:[#allocation2 + $0x81] sm:$0xff] }
  0x36   : > { %335 = vst.msk [vmem:[#allocation2 + $0x139] sm:$0xff] %vm222_vm1, %v302_v40  ;;  %336 = vst.msk [vmem:[#allocation2 + $0x141] sm:$0xff] %vm222_vm1, %v303_v42  ;;  %v5637_v49 = vld [vmem:[#allocation2 + $0x91] sm:$0xff]  ;;  %v5647_v50 = vld [vmem:[#allocation2 + $0x99] sm:$0xff] }
  0x37   : > { %4626 = vmatmul.mubr.msk.f32.gmra.mrb[4].mxu1 %vm222_vm1, %v5579_v34  ;;  %4823 = vmatmul.mubr.msk.f32.gmra.mrb[2].mxu0 %vm222_vm1, %v5579_v34  ;;  %337 = vst.msk [vmem:[#allocation2 + $0x151] sm:$0xff] %vm222_vm1, %v304_v44  ;;  %338 = vst.msk [vmem:[#allocation2 + $0x159] sm:$0xff] %vm222_vm1, %v305_v45  ;;  %v5649_v51 = vld [vmem:[#allocation2 + $0xa9] sm:$0xff]  ;;  %v5659_v52 = vld [vmem:[#allocation2 + $0xb1] sm:$0xff] }
  0x38   : > { %4628 = vmatprep.mubr.msk.f32.mxu1 %vm222_vm1, %v5583_v35  ;;  %4825 = vmatprep.mubr.msk.f32.mxu0 %vm222_vm1, %v5583_v35  ;;  %339 = vst.msk [vmem:[#allocation2 + $0x169] sm:$0xff] %vm222_vm1, %v306_v46  ;;  %340 = vst.msk [vmem:[#allocation2 + $0x171] sm:$0xff] %vm222_vm1, %v307_v47  ;;  %v5661_v53 = vld [vmem:[#allocation2 + $0xc1] sm:$0xff]  ;;  %v5671_v54 = vld [vmem:[#allocation2 + $0xc9] sm:$0xff] }
  0x39   : > { %6553 = vst [vmem:[#allocation3_spill] sm:$0xff] %v5671_v54  ;;  %v5673_v55 = vld [vmem:[#allocation2 + $0x1a] sm:$0xff]  ;;  %341 = vst.msk [vmem:[#allocation2 + $0x181] sm:$0xff] %vm222_vm1, %v308_v57  ;;  %v5691_v60 = vld [vmem:[#allocation2 + $0x22] sm:$0xff] }
  0x3a   : > { %v5675_v56 = vld [vmem:[#allocation2 + $0xd9] sm:$0xff]  ;;  %342 = vst.msk [vmem:[#allocation2 + $0x189] sm:$0xff] %vm222_vm1, %v309_v58  ;;  %v5689_v59 = vld [vmem:[#allocation2 + $0xe1] sm:$0xff]  ;;  %v5693_v61 = vld [vmem:[#allocation2 + $0xf1] sm:$0xff] }
  0x3b   : > { %4629 = vmatmul.mubr.msk.f32.gmra.mrb[6].mxu1 %vm222_vm1, %v5595_v36  ;;  %4826 = vmatmul.mubr.msk.f32.gmra.mrb[4].mxu0 %vm222_vm1, %v5595_v36  ;;  %6554 = vst [vmem:[#allocation4_spill] sm:$0xff] %v5675_v56  ;;  %6555 = vst [vmem:[#allocation5_spill] sm:$0xff] %v5689_v59  ;;  %v5695_v62 = vld [vmem:[#allocation2 + $0x32] sm:$0xff]  ;;  %v5712_v1 = vld [vmem:[#allocation2 + $0x3a] sm:$0xff] }
  0x3c   : > { %4631 = vmatprep.mubr.msk.f32.mxu1 %vm222_vm1, %v5597_v37  ;;  %4828 = vmatprep.mubr.msk.f32.mxu0 %vm222_vm1, %v5597_v37  ;;  %6556 = vst [vmem:[#allocation6_spill] sm:$0xff] %v5693_v61  ;;  %v5710_v0 = vld [vmem:[#allocation2 + $0xf9] sm:$0xff]  ;;  %v5716_v3 = vld [vmem:[#allocation2 + $0x109] sm:$0xff]  ;;  %v5730_v5 = vld [vmem:[#allocation2 + $0x111] sm:$0xff] }
  0x3d   : > { %6557 = vst [vmem:[#allocation7_spill] sm:$0xff] %v5710_v0  ;;  %6558 = vst [vmem:[#allocation8_spill] sm:$0xff] %v5716_v3  ;;  %v5718_v4 = vld [vmem:[#allocation2 + $0x4a] sm:$0xff]  ;;  %v5732_v6 = vld [vmem:[#allocation2 + $0x52] sm:$0xff] }
  0x3e   : > { %6559 = vst [vmem:[#allocation9_spill] sm:$0xff] %v5730_v5  ;;  %v5734_v7 = vld [vmem:[#allocation2 + $0x121] sm:$0xff]  ;;  %v5746_v10 = vld [vmem:[#allocation2 + $0x129] sm:$0xff]  ;;  %v5750_v12 = vld [vmem:[#allocation2 + $0x139] sm:$0xff] }
  0x3f   : > { %4632 = vmatmul.mubr.msk.f32.gmra.mrb[8].mxu1 %vm222_vm1, %v5611_v41  ;;  %4829 = vmatmul.mubr.msk.f32.gmra.mrb[6].mxu0 %vm222_vm1, %v5611_v41  ;;  %6560 = vst [vmem:[#allocation10_spill] sm:$0xff] %v5734_v7  ;;  %v5736_v9 = vld [vmem:[#allocation2 + $0x62] sm:$0xff]  ;;  %6561 = vst [vmem:[#allocation11_spill] sm:$0xff] %v5746_v10  ;;  %v5748_v11 = vld [vmem:[#allocation2 + $0x6a] sm:$0xff] }
  0x40   : > { %4634 = vmatprep.mubr.msk.f32.mxu1 %vm222_vm1, %v5616_v43  ;;  %4831 = vmatprep.mubr.msk.f32.mxu0 %vm222_vm1, %v5616_v43  ;;  %6562 = vst [vmem:[#allocation12_spill] sm:$0xff] %v5750_v12  ;;  %v5752_v13 = vld [vmem:[#allocation2 + $0x7a] sm:$0xff]  ;;  %v5764_v15 = vld [vmem:[#allocation2 + $0x82] sm:$0xff]  ;;  %v5766_v16 = vld [vmem:[#allocation2 + $0x151] sm:$0xff] }
  0x41   : > { %v5762_v14 = vld [vmem:[#allocation2 + $0x141] sm:$0xff]  ;;  %6564 = vst [vmem:[#allocation14_spill] sm:$0xff] %v5766_v16  ;;  %v5768_v17 = vld [vmem:[#allocation2 + $0x92] sm:$0xff]  ;;  %v5782_v20 = vld [vmem:[#allocation2 + $0x169] sm:$0xff] }
  0x42   : > { %6563 = vst [vmem:[#allocation13_spill] sm:$0xff] %v5762_v14  ;;  %v5778_v18 = vld [vmem:[#allocation2 + $0x159] sm:$0xff]  ;;  %6566 = vst [vmem:[#allocation16_spill] sm:$0xff] %v5782_v20  ;;  %v5784_v21 = vld [vmem:[#allocation2 + $0xaa] sm:$0xff] }
  0x43   : > { %4635 = vmatmul.mubr.msk.f32.gmra.mrb[10].mxu1 %vm222_vm1, %v5634_v48  ;;  %4832 = vmatmul.mubr.msk.f32.gmra.mrb[8].mxu0 %vm222_vm1, %v5634_v48  ;;  %6565 = vst [vmem:[#allocation15_spill] sm:$0xff] %v5778_v18  ;;  %v5780_v19 = vld [vmem:[#allocation2 + $0x9a] sm:$0xff]  ;;  %v5794_v22 = vld [vmem:[#allocation2 + $0x171] sm:$0xff]  ;;  %v5798_v25 = vld [vmem:[#allocation2 + $0xc2] sm:$0xff] }
  0x44   : > { %4637 = vmatprep.mubr.msk.f32.mxu1 %vm222_vm1, %v5637_v49  ;;  %4834 = vmatprep.mubr.msk.f32.mxu0 %vm222_vm1, %v5637_v49  ;;  %6567 = vst [vmem:[#allocation17_spill] sm:$0xff] %v5794_v22  ;;  %v5796_v23 = vld [vmem:[#allocation2 + $0xb2] sm:$0xff]  ;;  %v343_v24 = vld [vmem:[#allocation2] sm:$0xff]  ;;  %v344_v26 = vld [vmem:[#allocation2 + $0x8] sm:$0xff] }
  0x45   : > { %v5807_v27 = vld [vmem:[#allocation2 + $0xca] sm:$0xff]  ;;  %v5809_v28 = vld [vmem:[#allocation2 + $0x18] sm:$0xff]  ;;  %v5825_v31 = vld [vmem:[#allocation2 + $0x20] sm:$0xff] }
  0x46   : > { %6568 = vst [vmem:[#allocation18_spill] sm:$0xff] %v5809_v28  ;;  %v5811_v29 = vld [vmem:[#allocation2 + $0xda] sm:$0xff]  ;;  %v5819_v30 = vld [vmem:[%s6504_s1 + $0xc] sm:$0xf]  ;;  %6569 = vst [vmem:[#allocation19_spill] sm:$0xff] %v5825_v31 }
  0x47   : > { %4638 = vmatmul.mubr.msk.f32.gmra.mrb[12].mxu1 %vm222_vm1, %v5647_v50  ;;  %4835 = vmatmul.mubr.msk.f32.gmra.mrb[10].mxu0 %vm222_vm1, %v5647_v50  ;;  %v5831_v38 = vld [vmem:[#allocation2 + $0x30] sm:$0xff]  ;;  %v5847_v40 = vld [vmem:[#allocation2 + $0xfa] sm:$0xff]  ;;  %v5849_v42 = vld [vmem:[#allocation2 + $0x48] sm:$0xff] }
  0x48   : > { %4640 = vmatprep.mubr.msk.f32.mxu1 %vm222_vm1, %v5649_v51  ;;  %4837 = vmatprep.mubr.msk.f32.mxu0 %vm222_vm1, %v5649_v51  ;;  %6570 = vst [vmem:[#allocation20_spill] sm:$0xff] %v5831_v38  ;;  %v5833_v39 = vld [vmem:[#allocation2 + $0xf2] sm:$0xff]  ;;  %6572 = vst [vmem:[#allocation22_spill] sm:$0xff] %v5849_v42  ;;  %v5851_v44 = vld [vmem:[#allocation2 + $0x10a] sm:$0xff] }
  0x49   : > { %v5861_v45 = vld [vmem:[#allocation2 + $0x50] sm:$0xff]  ;;  %v5865_v47 = vld [vmem:[#allocation2 + $0x60] sm:$0xff]  ;;  %v5877_v58 = vld [vmem:[#allocation2 + $0x68] sm:$0xff] }
  0x4a   : > { %6573 = vst [vmem:[#allocation23_spill] sm:$0xff] %v5861_v45  ;;  %v5863_v46 = vld [vmem:[#allocation2 + $0x112] sm:$0xff]  ;;  %6574 = vst [vmem:[#allocation24_spill] sm:$0xff] %v5865_v47  ;;  %v5867_v57 = vld [vmem:[#allocation2 + $0x122] sm:$0xff] }
  0x4b   : > { %4641 = vmatmul.mubr.msk.f32.gmra.mrb[14].mxu1 %vm222_vm1, %v5659_v52  ;;  %4838 = vmatmul.mubr.msk.f32.gmra.mrb[12].mxu0 %vm222_vm1, %v5659_v52  ;;  %6575 = vst [vmem:[#allocation25_spill] sm:$0xff] %v5877_v58 }
  0x4c   : > { %4643 = vmatprep.mubr.msk.f32.mxu1 %vm222_vm1, %v5661_v53  ;;  %4840 = vmatprep.mubr.msk.f32.mxu0 %vm222_vm1, %v5661_v53 }
  0x4f   : > { %4644 = vmatmul.mubr.msk.f32.gmra.mrb[16].mxu1 %vm222_vm1, %v5671_v54  ;;  %4841 = vmatmul.mubr.msk.f32.gmra.mrb[14].mxu0 %vm222_vm1, %v5671_v54  ;;  %v5955_v54 = vld [vmem:[#allocation2 + $0xe0] sm:$0xff] }
  0x50   : > { %4646 = vmatprep.mubr.msk.f32.mxu1 %vm222_vm1, %v5675_v56  ;;  %4869 = vmatprep.mubr.msk.f32.mxu0 %vm222_vm1, %v5673_v55  ;;  %v5943_v56 = vld [vmem:[#allocation2 + $0x18a] sm:$0xff] }
  0x51   : > { %6583 = vst [vmem:[#allocation33_spill] sm:$0xff] %v5943_v56 }
  0x53   : > { %4647 = vmatmul.mubr.msk.f32.gmra.mrb[18].mxu1 %vm222_vm1, %v5689_v59  ;;  %4870 = vmatmul.mubr.msk.f32.vlgmr.msra.gmra.mrb[0].mxu0 %vm222_vm1, %v5691_v60  ;;  %v5931_v59 = vld [vmem:[#allocation2 + $0x182] sm:$0xff] }
  0x54   : > { %4918 = vmatpush3.msk.msra.mxu0 %vm506_vm0, %v5571_v33  ;;  %4649 = vmatprep.mubr.msk.f32.mxu1 %vm222_vm1, %v5693_v61  ;;  %v5827_v33 = vld [vmem:[#allocation2 + $0xe2] sm:$0xff]  ;;  %6582 = vst [vmem:[#allocation32_spill] sm:$0xff] %v5931_v59 }
  0x55   : > { %4872 = vmatprep.mubr.msk.f32.mxu0 %vm222_vm1, %v5695_v62  ;;  %4967 = vmatprep.subr.msk.mxu0 %vm506_vm0, %v5700_v63  ;;  %v5929_v61 = vld [vmem:[#allocation2 + $0xc0] sm:$0xff] }
  0x57   : > { %4650 = vmatmul.mubr.msk.f32.gmra.mrb[20].mxu1 %vm222_vm1, %v5710_v0  ;;  %4873 = vmatmul.mubr.msk.f32.gmra.mrb[2].mxu0 %vm222_vm1, %v5712_v1  ;;  %v5927_v0 = vld [vmem:[#allocation2 + $0x172] sm:$0xff] }
  0x58   : > { %4652 = vmatprep.mubr.msk.f32.mxu1 %vm222_vm1, %v5716_v3  ;;  %4875 = vmatprep.mubr.msk.f32.mxu0 %vm222_vm1, %v5718_v4  ;;  %v5925_v3 = vld [vmem:[#allocation2 + $0xb0] sm:$0xff]  ;;  %6581 = vst [vmem:[#allocation31_spill] sm:$0xff] %v5927_v0 }
  0x59   : > { %6580 = vst [vmem:[#allocation30_spill] sm:$0xff] %v5925_v3 }
  0x5b   : > { %4653 = vmatmul.mubr.msk.f32.gmra.mrb[22].mxu1 %vm222_vm1, %v5730_v5  ;;  %4876 = vmatmul.mubr.msk.f32.gmra.mrb[4].mxu0 %vm222_vm1, %v5732_v6  ;;  %v5915_v5 = vld [vmem:[#allocation2 + $0x16a] sm:$0xff] }
  0x5c   : > { %4655 = vmatprep.mubr.msk.f32.mxu1 %vm222_vm1, %v5734_v7  ;;  %4878 = vmatprep.mubr.msk.f32.mxu0 %vm222_vm1, %v5736_v9  ;;  %v5913_v7 = vld [vmem:[#allocation2 + $0xa8] sm:$0xff] }
  0x5f   : > { %4656 = vmatmul.mubr.msk.f32.gmra.mrb[24].mxu1 %vm222_vm1, %v5746_v10  ;;  %4879 = vmatmul.mubr.msk.f32.gmra.mrb[6].mxu0 %vm222_vm1, %v5748_v11  ;;  %v5911_v10 = vld [vmem:[#allocation2 + $0x15a] sm:$0xff] }
  0x60   : > { %4658 = vmatprep.mubr.msk.f32.mxu1 %vm222_vm1, %v5750_v12  ;;  %4881 = vmatprep.mubr.msk.f32.mxu0 %vm222_vm1, %v5752_v13  ;;  %v5909_v12 = vld [vmem:[#allocation2 + $0x98] sm:$0xff] }
  0x61   : > { %6579 = vst [vmem:[#allocation29_spill] sm:$0xff] %v5909_v12 }
  0x63   : > { %4659 = vmatmul.mubr.msk.f32.gmra.mrb[26].mxu1 %vm222_vm1, %v5762_v14  ;;  %4882 = vmatmul.mubr.msk.f32.gmra.mrb[8].mxu0 %vm222_vm1, %v5764_v15  ;;  %v5899_v14 = vld [vmem:[#allocation2 + $0x152] sm:$0xff] }
  0x64   : > { %4661 = vmatprep.mubr.msk.f32.mxu1 %vm222_vm1, %v5766_v16  ;;  %4884 = vmatprep.mubr.msk.f32.mxu0 %vm222_vm1, %v5768_v17  ;;  %v5897_v16 = vld [vmem:[#allocation2 + $0x90] sm:$0xff] }
  0x65   : > { %6578 = vst [vmem:[#allocation28_spill] sm:$0xff] %v5897_v16 }
  0x67   : > { %4662 = vmatmul.mubr.msk.f32.gmra.mrb[28].mxu1 %vm222_vm1, %v5778_v18  ;;  %4885 = vmatmul.mubr.msk.f32.gmra.mrb[10].mxu0 %vm222_vm1, %v5780_v19  ;;  %v5895_v18 = vld [vmem:[#allocation2 + $0x142] sm:$0xff] }
  0x68   : > { %4664 = vmatprep.mubr.msk.f32.mxu1 %vm222_vm1, %v5782_v20  ;;  %4887 = vmatprep.mubr.msk.f32.mxu0 %vm222_vm1, %v5784_v21  ;;  %v5893_v20 = vld [vmem:[#allocation2 + $0x80] sm:$0xff] }
  0x69   : > { %6577 = vst [vmem:[#allocation27_spill] sm:$0xff] %v5893_v20 }
  0x6b   : > { %4665 = vmatmul.mubr.msk.f32.gmra.mrb[30].mxu1 %vm222_vm1, %v5794_v22  ;;  %4888 = vmatmul.mubr.msk.f32.gmra.mrb[12].mxu0 %vm222_vm1, %v5796_v23  ;;  %v5883_v22 = vld [vmem:[#allocation2 + $0x13a] sm:$0xff] }
  0x6c   : > { %4669 = vmatprep.mubr.msk.f32.mxu1 %vm222_vm1, %v343_v24  ;;  %4890 = vmatprep.mubr.msk.f32.mxu0 %vm222_vm1, %v5798_v25  ;;  %v5879_v24 = vld [vmem:[#allocation2 + $0x12a] sm:$0xff] }
  0x6f   : > { %4670 = vmatmul.mubr.msk.f32.vlgmr.msra.gmra.mrb[0].mxu1 %vm222_vm1, %v344_v26  ;;  %4891 = vmatmul.mubr.msk.f32.gmra.mrb[14].mxu0 %vm222_vm1, %v5807_v27  ;;  %v5881_v26 = vld [vmem:[#allocation2 + $0x78] sm:$0xff] }
  0x70   : > { %4672 = vmatprep.mubr.msk.f32.mxu1 %vm222_vm1, %v5809_v28  ;;  %4893 = vmatprep.mubr.msk.f32.mxu0 %vm222_vm1, %v5811_v29  ;;  %6576 = vst [vmem:[#allocation26_spill] sm:$0xff] %v5881_v26  ;;  %v5945_v28 = vld [vmem:[#allocation2 + $0xd8] sm:$0xff] }
  0x71   : > { %4718 = vmatpush3.msk.msra.mxu1 %vm506_vm0, %v5516_v8  ;;  %v5845_v8 = vld [vmem:[#allocation2 + $0x38] sm:$0xff] }
  0x72   : > { %4767 = vmatprep.subr.msk.mxu1 %vm506_vm0, %v5819_v30  ;;  %6571 = vst [vmem:[#allocation21_spill] sm:$0xff] %v5845_v8 }
  0x73   : > { %4673 = vmatmul.mubr.msk.f32.gmra.mrb[2].mxu1 %vm222_vm1, %v5825_v31  ;;  %4894 = vmatmul.mubr.msk.f32.gmra.mrb[16].mxu0 %vm222_vm1, %v5827_v33  ;;  %v5941_v31 = vld [vmem:[#allocation2 + $0xc8] sm:$0xff] }
  0x74   : > { %4675 = vmatprep.mubr.msk.f32.mxu1 %vm222_vm1, %v5831_v38  ;;  %4896 = vmatprep.mubr.msk.f32.mxu0 %vm222_vm1, %v5833_v39 }
  0x77   : > { %4676 = vmatmul.mubr.msk.f32.gmra.mrb[4].mxu1 %vm222_vm1, %v5845_v8  ;;  %4897 = vmatmul.mubr.msk.f32.gmra.mrb[18].mxu0 %vm222_vm1, %v5847_v40 }
  0x78   : > { %4678 = vmatprep.mubr.msk.f32.mxu1 %vm222_vm1, %v5849_v42  ;;  %4899 = vmatprep.mubr.msk.f32.mxu0 %vm222_vm1, %v5851_v44 }
  0x7b   : > { %4679 = vmatmul.mubr.msk.f32.gmra.mrb[6].mxu1 %vm222_vm1, %v5861_v45  ;;  %4900 = vmatmul.mubr.msk.f32.gmra.mrb[20].mxu0 %vm222_vm1, %v5863_v46 }
  0x7c   : > { %4681 = vmatprep.mubr.msk.f32.mxu1 %vm222_vm1, %v5865_v47  ;;  %4902 = vmatprep.mubr.msk.f32.mxu0 %vm222_vm1, %v5867_v57 }
  0x7f   : > { %4682 = vmatmul.mubr.msk.f32.gmra.mrb[8].mxu1 %vm222_vm1, %v5877_v58  ;;  %4903 = vmatmul.mubr.msk.f32.gmra.mrb[22].mxu0 %vm222_vm1, %v5879_v24 }
  0x80   : > { %4684 = vmatprep.mubr.msk.f32.mxu1 %vm222_vm1, %v5881_v26  ;;  %4905 = vmatprep.mubr.msk.f32.mxu0 %vm222_vm1, %v5883_v22 }
  0x83   : > { %4685 = vmatmul.mubr.msk.f32.gmra.mrb[10].mxu1 %vm222_vm1, %v5893_v20  ;;  %4906 = vmatmul.mubr.msk.f32.gmra.mrb[24].mxu0 %vm222_vm1, %v5895_v18 }
  0x84   : > { %4687 = vmatprep.mubr.msk.f32.mxu1 %vm222_vm1, %v5897_v16  ;;  %4908 = vmatprep.mubr.msk.f32.mxu0 %vm222_vm1, %v5899_v14 }
  0x87   : > { %4688 = vmatmul.mubr.msk.f32.gmra.mrb[12].mxu1 %vm222_vm1, %v5909_v12  ;;  %4909 = vmatmul.mubr.msk.f32.gmra.mrb[26].mxu0 %vm222_vm1, %v5911_v10 }
  0x88   : > { %4690 = vmatprep.mubr.msk.f32.mxu1 %vm222_vm1, %v5913_v7  ;;  %4911 = vmatprep.mubr.msk.f32.mxu0 %vm222_vm1, %v5915_v5 }
  0x8b   : > { %4691 = vmatmul.mubr.msk.f32.gmra.mrb[14].mxu1 %vm222_vm1, %v5925_v3  ;;  %4912 = vmatmul.mubr.msk.f32.gmra.mrb[28].mxu0 %vm222_vm1, %v5927_v0  ;;  %v5962_v0 = vld [vmem:[%s6504_s1 + $0x20] sm:$0xf] }
  0x8c   : > { %4693 = vmatprep.mubr.msk.f32.mxu1 %vm222_vm1, %v5929_v61  ;;  %4914 = vmatprep.mubr.msk.f32.mxu0 %vm222_vm1, %v5931_v59  ;;  %v5957_v59 = vld [vmem:[#allocation2 + $0xf0] sm:$0xff] }
  0x8f   : > { %4694 = vmatmul.mubr.msk.f32.gmra.mrb[16].mxu1 %vm222_vm1, %v5941_v31  ;;  %4915 = vmatmul.mubr.msk.f32.gmra.mrb[30].mxu0 %vm222_vm1, %v5943_v56  ;;  %v5972_v56 = vld [vmem:[#allocation2 + $0xf8] sm:$0xff] }
  0x90   : > { %4696 = vmatprep.mubr.msk.f32.mxu1 %vm222_vm1, %v5945_v28  ;;  %4919 = vmatprep.mubr.msk.f32.mxu0 %vm222_vm1, %v5831_v38  ;;  %v5976_v38 = vld [vmem:[#allocation2 + $0x108] sm:$0xff] }
  0x93   : > { %4697 = vmatmul.mubr.msk.f32.gmra.mrb[18].mxu1 %vm222_vm1, %v5955_v54  ;;  %4920 = vmatmul.mubr.msk.f32.vlgmr.msra.gmra.mrb[0].mxu0 %vm222_vm1, %v5845_v8  ;;  %v6002_v8 = vld [vmem:[#allocation2 + $0x138] sm:$0xff] }
  0x94   : > { %4968 = vmatpush3.msk.msra.mxu0 %vm506_vm0, %v5700_v63  ;;  %4699 = vmatprep.mubr.msk.f32.mxu1 %vm222_vm1, %v5957_v59  ;;  %v5988_v63 = vld [vmem:[#allocation2 + $0x110] sm:$0xff] }
  0x95   : > { %4922 = vmatprep.mubr.msk.f32.mxu0 %vm222_vm1, %v5849_v42  ;;  %5017 = vmatprep.subr.msk.mxu0 %vm506_vm0, %v5962_v0  ;;  %v5990_v42 = vld [vmem:[#allocation2 + $0x120] sm:$0xff] }
  0x97   : > { %4700 = vmatmul.mubr.msk.f32.gmra.mrb[20].mxu1 %vm222_vm1, %v5972_v56  ;;  %4923 = vmatmul.mubr.msk.f32.gmra.mrb[2].mxu0 %vm222_vm1, %v5861_v45  ;;  %v6000_v45 = vld [vmem:[#allocation2 + $0x128] sm:$0xff] }
  0x98   : > { %4702 = vmatprep.mubr.msk.f32.mxu1 %vm222_vm1, %v5976_v38  ;;  %4925 = vmatprep.mubr.msk.f32.mxu0 %vm222_vm1, %v5865_v47  ;;  %v6014_v47 = vld [vmem:[#allocation2 + $0x150] sm:$0xff] }
  0x9b   : > { %4703 = vmatmul.mubr.msk.f32.gmra.mrb[22].mxu1 %vm222_vm1, %v5988_v63  ;;  %4926 = vmatmul.mubr.msk.f32.gmra.mrb[4].mxu0 %vm222_vm1, %v5877_v58  ;;  %v6012_v58 = vld [vmem:[#allocation2 + $0x140] sm:$0xff] }
  0x9c   : > { %4705 = vmatprep.mubr.msk.f32.mxu1 %vm222_vm1, %v5990_v42  ;;  %4928 = vmatprep.mubr.msk.f32.mxu0 %vm222_vm1, %v5881_v26  ;;  %v6026_v26 = vld [vmem:[#allocation2 + $0x168] sm:$0xff] }
  0x9f   : > { %4706 = vmatmul.mubr.msk.f32.gmra.mrb[24].mxu1 %vm222_vm1, %v6000_v45  ;;  %4929 = vmatmul.mubr.msk.f32.gmra.mrb[6].mxu0 %vm222_vm1, %v5893_v20  ;;  %v6024_v20 = vld [vmem:[#allocation2 + $0x158] sm:$0xff] }
  0xa0   : > { %4708 = vmatprep.mubr.msk.f32.mxu1 %vm222_vm1, %v6002_v8  ;;  %4931 = vmatprep.mubr.msk.f32.mxu0 %vm222_vm1, %v5897_v16  ;;  %v1059_v16 = vld [vmem:[#allocation2 + $0x2] sm:$0xff] }
  0xa3   : > { %4709 = vmatmul.mubr.msk.f32.gmra.mrb[26].mxu1 %vm222_vm1, %v6012_v58  ;;  %4932 = vmatmul.mubr.msk.f32.gmra.mrb[8].mxu0 %vm222_vm1, %v5909_v12  ;;  %v6036_v12 = vld [vmem:[#allocation2 + $0x170] sm:$0xff] }
  0xa4   : > { %4711 = vmatprep.mubr.msk.f32.mxu1 %vm222_vm1, %v6014_v47  ;;  %4934 = vmatprep.mubr.msk.f32.mxu0 %vm222_vm1, %v5913_v7 }
  0xa7   : > { %4712 = vmatmul.mubr.msk.f32.gmra.mrb[28].mxu1 %vm222_vm1, %v6024_v20  ;;  %4935 = vmatmul.mubr.msk.f32.gmra.mrb[10].mxu0 %vm222_vm1, %v5925_v3  ;;  %v1060_v3 = vld [vmem:[#allocation2 + $0xa] sm:$0xff] }
  0xa8   : > { %4714 = vmatprep.mubr.msk.f32.mxu1 %vm222_vm1, %v6026_v26  ;;  %4937 = vmatprep.mubr.msk.f32.mxu0 %vm222_vm1, %v5929_v61 }
  0xab   : > { %4715 = vmatmul.mubr.msk.f32.gmra.mrb[30].mxu1 %vm222_vm1, %v6036_v12  ;;  %4938 = vmatmul.mubr.msk.f32.gmra.mrb[12].mxu0 %vm222_vm1, %v5941_v31 }
  0xac   : > { %4719 = vmatprep.mubr.msk.f32.mxu1 %vm222_vm1, %v1059_v16  ;;  %4940 = vmatprep.mubr.msk.f32.mxu0 %vm222_vm1, %v5945_v28  ;;  %v2651_v16 = vld [vmem:[#allocation2 + $0x1a0] sm:$0xff] }
  0xaf   : > { %4720 = vmatmul.mubr.msk.f32.vlgmr.msra.gmra.mrb[0].mxu1 %vm222_vm1, %v1060_v3  ;;  %4941 = vmatmul.mubr.msk.f32.gmra.mrb[14].mxu0 %vm222_vm1, %v5955_v54  ;;  %v2650_v3 = vld [vmem:[#allocation2 + $0x198] sm:$0xff] }
  0xb0   : > { %4722 = vmatprep.mubr.msk.f32.mxu1 %vm222_vm1, %v5673_v55  ;;  %4943 = vmatprep.mubr.msk.f32.mxu0 %vm222_vm1, %v5957_v59  ;;  %v6096_v55 = vld [vmem:[#allocation2 + $0x180] sm:$0xff] }
  0xb1   : > { %4768 = vmatpush3.msk.msra.mxu1 %vm506_vm0, %v5819_v30  ;;  %v6598_v30 = vld [vmem:[#allocation24_spill] sm:$0xff] }
  0xb2   : > { %5067 = vmatprep.subr.msk.mxu1 %vm506_vm0, %v5479_v2 }
  0xb3   : > { %4723 = vmatmul.mubr.msk.f32.gmra.mrb[2].mxu1 %vm222_vm1, %v5691_v60  ;;  %4944 = vmatmul.mubr.msk.f32.gmra.mrb[16].mxu0 %vm222_vm1, %v5972_v56  ;;  %v6106_v60 = vld [vmem:[#allocation2 + $0x188] sm:$0xff] }
  0xb4   : > { %4725 = vmatprep.mubr.msk.f32.mxu1 %vm222_vm1, %v5695_v62  ;;  %4946 = vmatprep.mubr.msk.f32.mxu0 %vm222_vm1, %v5976_v38 }
  0xb7   : > { %4726 = vmatmul.mubr.msk.f32.gmra.mrb[4].mxu1 %vm222_vm1, %v5712_v1  ;;  %4947 = vmatmul.mubr.msk.f32.gmra.mrb[18].mxu0 %vm222_vm1, %v5988_v63 }
  0xb8   : > { %4728 = vmatprep.mubr.msk.f32.mxu1 %vm222_vm1, %v5718_v4  ;;  %4949 = vmatprep.mubr.msk.f32.mxu0 %vm222_vm1, %v5990_v42 }
  0xbb   : > { %4729 = vmatmul.mubr.msk.f32.gmra.mrb[6].mxu1 %vm222_vm1, %v5732_v6  ;;  %4950 = vmatmul.mubr.msk.f32.gmra.mrb[20].mxu0 %vm222_vm1, %v6000_v45 }
  0xbc   : > { %4731 = vmatprep.mubr.msk.f32.mxu1 %vm222_vm1, %v5736_v9  ;;  %4952 = vmatprep.mubr.msk.f32.mxu0 %vm222_vm1, %v6002_v8 }
  0xbf   : > { %4732 = vmatmul.mubr.msk.f32.gmra.mrb[8].mxu1 %vm222_vm1, %v5748_v11  ;;  %4953 = vmatmul.mubr.msk.f32.gmra.mrb[22].mxu0 %vm222_vm1, %v6012_v58 }
  0xc0   : > { %4734 = vmatprep.mubr.msk.f32.mxu1 %vm222_vm1, %v5752_v13  ;;  %4955 = vmatprep.mubr.msk.f32.mxu0 %vm222_vm1, %v6014_v47 }
  0xc3   : > { %4735 = vmatmul.mubr.msk.f32.gmra.mrb[10].mxu1 %vm222_vm1, %v5764_v15  ;;  %4956 = vmatmul.mubr.msk.f32.gmra.mrb[24].mxu0 %vm222_vm1, %v6024_v20 }
  0xc4   : > { %4737 = vmatprep.mubr.msk.f32.mxu1 %vm222_vm1, %v5768_v17  ;;  %4958 = vmatprep.mubr.msk.f32.mxu0 %vm222_vm1, %v6026_v26 }
  0xc7   : > { %4738 = vmatmul.mubr.msk.f32.gmra.mrb[12].mxu1 %vm222_vm1, %v5780_v19  ;;  %4959 = vmatmul.mubr.msk.f32.gmra.mrb[26].mxu0 %vm222_vm1, %v6036_v12 }
  0xc8   : > { %4740 = vmatprep.mubr.msk.f32.mxu1 %vm222_vm1, %v5784_v21  ;;  %4961 = vmatprep.mubr.msk.f32.mxu0 %vm222_vm1, %v6096_v55 }
  0xcb   : > { %4741 = vmatmul.mubr.msk.f32.gmra.mrb[14].mxu1 %vm222_vm1, %v5796_v23  ;;  %4962 = vmatmul.mubr.msk.f32.gmra.mrb[28].mxu0 %vm222_vm1, %v6106_v60 }
  0xcc   : > { %4743 = vmatprep.mubr.msk.f32.mxu1 %vm222_vm1, %v5798_v25  ;;  %4964 = vmatprep.mubr.msk.f32.mxu0 %vm222_vm1, %v2650_v3  ;;  %v6600_v3 = vld [vmem:[#allocation25_spill] sm:$0xff] }
  0xcf   : > { %4744 = vmatmul.mubr.msk.f32.gmra.mrb[16].mxu1 %vm222_vm1, %v5807_v27  ;;  %4965 = vmatmul.mubr.msk.f32.gmra.mrb[30].mxu0 %vm222_vm1, %v2651_v16  ;;  %v6601_v16 = vld [vmem:[#allocation11_spill] sm:$0xff] }
  0xd0   : > { %4746 = vmatprep.mubr.msk.f32.mxu1 %vm222_vm1, %v5811_v29  ;;  %4969 = vmatprep.mubr.msk.f32.mxu0 %vm222_vm1, %v5561_v32  ;;  %v6584_v32 = vld [vmem:[#allocation31_spill] sm:$0xff] }
  0xd3   : > { %4747 = vmatmul.mubr.msk.f32.gmra.mrb[18].mxu1 %vm222_vm1, %v5827_v33  ;;  %4970 = vmatmul.mubr.msk.f32.vlgmr.msra.gmra.mrb[0].mxu0 %vm222_vm1, %v5579_v34  ;;  %v6585_v34 = vld [vmem:[#allocation3_spill] sm:$0xff] }
  0xd4   : > { %5018 = vmatpush3.msk.msra.mxu0 %vm506_vm0, %v5962_v0  ;;  %4749 = vmatprep.mubr.msk.f32.mxu1 %vm222_vm1, %v5833_v39  ;;  %v6597_v0 = vld [vmem:[#allocation9_spill] sm:$0xff] }
  0xd5   : > { %4972 = vmatprep.mubr.msk.f32.mxu0 %vm222_vm1, %v5583_v35  ;;  %v6586_v35 = vld [vmem:[#allocation18_spill] sm:$0xff] }
  0xd7   : > { %4750 = vmatmul.mubr.msk.f32.gmra.mrb[20].mxu1 %vm222_vm1, %v5847_v40  ;;  %4973 = vmatmul.mubr.msk.f32.gmra.mrb[2].mxu0 %vm222_vm1, %v5595_v36  ;;  %v6587_v36 = vld [vmem:[#allocation4_spill] sm:$0xff] }
  0xd8   : > { %4752 = vmatprep.mubr.msk.f32.mxu1 %vm222_vm1, %v5851_v44  ;;  %4975 = vmatprep.mubr.msk.f32.mxu0 %vm222_vm1, %v5597_v37  ;;  %v6588_v37 = vld [vmem:[#allocation19_spill] sm:$0xff] }
  0xdb   : > { %4753 = vmatmul.mubr.msk.f32.gmra.mrb[22].mxu1 %vm222_vm1, %v5863_v46  ;;  %4976 = vmatmul.mubr.msk.f32.gmra.mrb[4].mxu0 %vm222_vm1, %v5611_v41  ;;  %v6589_v41 = vld [vmem:[#allocation5_spill] sm:$0xff] }
  0xdc   : > { %4755 = vmatprep.mubr.msk.f32.mxu1 %vm222_vm1, %v5867_v57  ;;  %4978 = vmatprep.mubr.msk.f32.mxu0 %vm222_vm1, %v5616_v43  ;;  %v6590_v43 = vld [vmem:[#allocation20_spill] sm:$0xff] }
  0xdf   : > { %4756 = vmatmul.mubr.msk.f32.gmra.mrb[24].mxu1 %vm222_vm1, %v5879_v24  ;;  %4979 = vmatmul.mubr.msk.f32.gmra.mrb[6].mxu0 %vm222_vm1, %v5634_v48  ;;  %v6591_v48 = vld [vmem:[#allocation6_spill] sm:$0xff] }
  0xe0   : > { %4758 = vmatprep.mubr.msk.f32.mxu1 %vm222_vm1, %v5883_v22  ;;  %4981 = vmatprep.mubr.msk.f32.mxu0 %vm222_vm1, %v5637_v49  ;;  %v6592_v49 = vld [vmem:[#allocation21_spill] sm:$0xff] }
  0xe3   : > { %4759 = vmatmul.mubr.msk.f32.gmra.mrb[26].mxu1 %vm222_vm1, %v5895_v18  ;;  %4982 = vmatmul.mubr.msk.f32.gmra.mrb[8].mxu0 %vm222_vm1, %v5647_v50  ;;  %v6593_v50 = vld [vmem:[#allocation7_spill] sm:$0xff] }
  0xe4   : > { %4761 = vmatprep.mubr.msk.f32.mxu1 %vm222_vm1, %v5899_v14  ;;  %4984 = vmatprep.mubr.msk.f32.mxu0 %vm222_vm1, %v5649_v51  ;;  %v6594_v51 = vld [vmem:[#allocation22_spill] sm:$0xff] }
  0xe7   : > { %4762 = vmatmul.mubr.msk.f32.gmra.mrb[28].mxu1 %vm222_vm1, %v5911_v10  ;;  %4985 = vmatmul.mubr.msk.f32.gmra.mrb[10].mxu0 %vm222_vm1, %v5659_v52  ;;  %v6595_v52 = vld [vmem:[#allocation8_spill] sm:$0xff] }
  0xe8   : > { %4764 = vmatprep.mubr.msk.f32.mxu1 %vm222_vm1, %v5915_v5  ;;  %4987 = vmatprep.mubr.msk.f32.mxu0 %vm222_vm1, %v5661_v53  ;;  %v6596_v53 = vld [vmem:[#allocation23_spill] sm:$0xff] }
  0xeb   : > { %4765 = vmatmul.mubr.msk.f32.gmra.mrb[30].mxu1 %vm222_vm1, %v6584_v32  ;;  %4988 = vmatmul.mubr.msk.f32.gmra.mrb[12].mxu0 %vm222_vm1, %v6585_v34  ;;  %v6602_v34 = vld [vmem:[#allocation26_spill] sm:$0xff] }
  0xec   : > { %4769 = vmatprep.mubr.msk.f32.mxu1 %vm222_vm1, %v6586_v35  ;;  %4990 = vmatprep.mubr.msk.f32.mxu0 %vm222_vm1, %v6587_v36  ;;  %v6603_v35 = vld [vmem:[#allocation12_spill] sm:$0xff] }
  0xef   : > { %4770 = vmatmul.mubr.msk.f32.vlgmr.msra.gmra.mrb[0].mxu1 %vm222_vm1, %v6588_v37  ;;  %4991 = vmatmul.mubr.msk.f32.gmra.mrb[14].mxu0 %vm222_vm1, %v6589_v41  ;;  %v6604_v37 = vld [vmem:[#allocation27_spill] sm:$0xff] }
  0xf0   : > { %4772 = vmatprep.mubr.msk.f32.mxu1 %vm222_vm1, %v6590_v43  ;;  %4993 = vmatprep.mubr.msk.f32.mxu0 %vm222_vm1, %v6591_v48  ;;  %v6605_v43 = vld [vmem:[#allocation13_spill] sm:$0xff] }
  0xf1   : > { %5068 = vmatpush3.msk.msra.mxu1 %vm506_vm0, %v5479_v2  ;;  %v6599_v2 = vld [vmem:[#allocation10_spill] sm:$0xff] }
  0xf3   : > { %4773 = vmatmul.mubr.msk.f32.gmra.mrb[2].mxu1 %vm222_vm1, %v6592_v49  ;;  %4994 = vmatmul.mubr.msk.f32.gmra.mrb[16].mxu0 %vm222_vm1, %v6593_v50  ;;  %v6606_v49 = vld [vmem:[#allocation28_spill] sm:$0xff] }
  0xf4   : > { %4775 = vmatprep.mubr.msk.f32.mxu1 %vm222_vm1, %v6594_v51  ;;  %4996 = vmatprep.mubr.msk.f32.mxu0 %vm222_vm1, %v6595_v52  ;;  %v6607_v51 = vld [vmem:[#allocation14_spill] sm:$0xff] }
  0xf7   : > { %4776 = vmatmul.mubr.msk.f32.gmra.mrb[4].mxu1 %vm222_vm1, %v6596_v53  ;;  %4997 = vmatmul.mubr.msk.f32.gmra.mrb[18].mxu0 %vm222_vm1, %v6597_v0  ;;  %v6608_v53 = vld [vmem:[#allocation29_spill] sm:$0xff] }
  0xf8   : > { %4778 = vmatprep.mubr.msk.f32.mxu1 %vm222_vm1, %v6598_v30  ;;  %4999 = vmatprep.mubr.msk.f32.mxu0 %vm222_vm1, %v6599_v2  ;;  %v6609_v30 = vld [vmem:[#allocation15_spill] sm:$0xff] }
  0xfb   : > { %4779 = vmatmul.mubr.msk.f32.gmra.mrb[6].mxu1 %vm222_vm1, %v6600_v3  ;;  %5000 = vmatmul.mubr.msk.f32.gmra.mrb[20].mxu0 %vm222_vm1, %v6601_v16  ;;  %v6610_v3 = vld [vmem:[#allocation16_spill] sm:$0xff] }
  0xfc   : > { %4781 = vmatprep.mubr.msk.f32.mxu1 %vm222_vm1, %v6602_v34  ;;  %5002 = vmatprep.mubr.msk.f32.mxu0 %vm222_vm1, %v6603_v35  ;;  %v6230_v34 = vld [vmem:[#allocation2 + $0x181] sm:$0xff] }
  0xff   : > { %4782 = vmatmul.mubr.msk.f32.gmra.mrb[8].mxu1 %vm222_vm1, %v6604_v37  ;;  %5003 = vmatmul.mubr.msk.f32.gmra.mrb[22].mxu0 %vm222_vm1, %v6605_v43  ;;  %v6611_v37 = vld [vmem:[#allocation30_spill] sm:$0xff] }
 0x100   : > { %4784 = vmatprep.mubr.msk.f32.mxu1 %vm222_vm1, %v6606_v49  ;;  %5005 = vmatprep.mubr.msk.f32.mxu0 %vm222_vm1, %v6607_v51  ;;  %v6612_v49 = vld [vmem:[#allocation17_spill] sm:$0xff] }
 0x103   : > { %4785 = vmatmul.mubr.msk.f32.gmra.mrb[10].mxu1 %vm222_vm1, %v6608_v53  ;;  %5006 = vmatmul.mubr.msk.f32.gmra.mrb[24].mxu0 %vm222_vm1, %v6609_v30  ;;  %v6240_v53 = vld [vmem:[#allocation2 + $0x189] sm:$0xff] }
 0x104   : > { %4787 = vmatprep.mubr.msk.f32.mxu1 %vm222_vm1, %v5913_v7  ;;  %5008 = vmatprep.mubr.msk.f32.mxu0 %vm222_vm1, %v6610_v3  ;;  %v3040_v7 = vld [vmem:[#allocation2 + $0x199] sm:$0xff] }
 0x107   : > { %4788 = vmatmul.mubr.msk.f32.gmra.mrb[12].mxu1 %vm222_vm1, %v6611_v37  ;;  %5009 = vmatmul.mubr.msk.f32.gmra.mrb[26].mxu0 %vm222_vm1, %v6612_v49  ;;  %v3041_v37 = vld [vmem:[#allocation2 + $0x1a1] sm:$0xff] }
 0x108   : > { %4790 = vmatprep.mubr.msk.f32.mxu1 %vm222_vm1, %v5929_v61  ;;  %5011 = vmatprep.mubr.msk.f32.mxu0 %vm222_vm1, %v6230_v34  ;;  %v3431_v61 = vld [vmem:[#allocation2 + $0x1a2] sm:$0xff] }
 0x10b   : > { %4791 = vmatmul.mubr.msk.f32.gmra.mrb[14].mxu1 %vm222_vm1, %v5941_v31  ;;  %5012 = vmatmul.mubr.msk.f32.gmra.mrb[28].mxu0 %vm222_vm1, %v6240_v53 }
 0x10c   : > { %4793 = vmatprep.mubr.msk.f32.mxu1 %vm222_vm1, %v5945_v28  ;;  %5014 = vmatprep.mubr.msk.f32.mxu0 %vm222_vm1, %v3040_v7 }
 0x10f   : > { %4794 = vmatmul.mubr.msk.f32.gmra.mrb[16].mxu1 %vm222_vm1, %v5955_v54  ;;  %5015 = vmatmul.mubr.msk.f32.gmra.mrb[30].mxu0 %vm222_vm1, %v3041_v37  ;;  %v6613_v54 = vld [vmem:[#allocation32_spill] sm:$0xff] }
 0x110   : > { %4796 = vmatprep.mubr.msk.f32.mxu1 %vm222_vm1, %v5957_v59  ;;  %5019 = vmatprep.mubr.msk.f32.mxu0 %vm222_vm1, %v5695_v62  ;;  %v6614_v59 = vld [vmem:[#allocation33_spill] sm:$0xff] }
 0x113   : > { %4797 = vmatmul.mubr.msk.f32.gmra.mrb[18].mxu1 %vm222_vm1, %v5972_v56  ;;  %5020 = vmatmul.mubr.msk.f32.vlgmr.msra.gmra.mrb[0].mxu0 %vm222_vm1, %v5712_v1  ;;  %v3430_v56 = vld [vmem:[#allocation2 + $0x19a] sm:$0xff] }
 0x114   : > { %4799 = vmatprep.mubr.msk.f32.mxu1 %vm222_vm1, %v5976_v38  ;;  %5022 = vmatprep.mubr.msk.f32.mxu0 %vm222_vm1, %v5718_v4 }
 0x117   : > { %4800 = vmatmul.mubr.msk.f32.gmra.mrb[20].mxu1 %vm222_vm1, %v5988_v63  ;;  %5023 = vmatmul.mubr.msk.f32.gmra.mrb[2].mxu0 %vm222_vm1, %v5732_v6 }
 0x118   : > { %4802 = vmatprep.mubr.msk.f32.mxu1 %vm222_vm1, %v5990_v42  ;;  %5025 = vmatprep.mubr.msk.f32.mxu0 %vm222_vm1, %v5736_v9 }
 0x11b   : > { %4803 = vmatmul.mubr.msk.f32.gmra.mrb[22].mxu1 %vm222_vm1, %v6000_v45  ;;  %5026 = vmatmul.mubr.msk.f32.gmra.mrb[4].mxu0 %vm222_vm1, %v5748_v11 }
 0x11c   : > { %4805 = vmatprep.mubr.msk.f32.mxu1 %vm222_vm1, %v6002_v8  ;;  %5028 = vmatprep.mubr.msk.f32.mxu0 %vm222_vm1, %v5752_v13 }
 0x11f   : > { %4806 = vmatmul.mubr.msk.f32.gmra.mrb[24].mxu1 %vm222_vm1, %v6012_v58  ;;  %5029 = vmatmul.mubr.msk.f32.gmra.mrb[6].mxu0 %vm222_vm1, %v5764_v15 }
 0x120   : > { %4808 = vmatprep.mubr.msk.f32.mxu1 %vm222_vm1, %v6014_v47  ;;  %5031 = vmatprep.mubr.msk.f32.mxu0 %vm222_vm1, %v5768_v17 }
 0x123   : > { %4809 = vmatmul.mubr.msk.f32.gmra.mrb[26].mxu1 %vm222_vm1, %v6024_v20  ;;  %5032 = vmatmul.mubr.msk.f32.gmra.mrb[8].mxu0 %vm222_vm1, %v5780_v19 }
 0x124   : > { %4811 = vmatprep.mubr.msk.f32.mxu1 %vm222_vm1, %v6026_v26  ;;  %5034 = vmatprep.mubr.msk.f32.mxu0 %vm222_vm1, %v5784_v21 }
 0x127   : > { %4812 = vmatmul.mubr.msk.f32.gmra.mrb[28].mxu1 %vm222_vm1, %v6036_v12  ;;  %5035 = vmatmul.mubr.msk.f32.gmra.mrb[10].mxu0 %vm222_vm1, %v5796_v23 }
 0x128   : > { %4814 = vmatprep.mubr.msk.f32.mxu1 %vm222_vm1, %v6096_v55  ;;  %5037 = vmatprep.mubr.msk.f32.mxu0 %vm222_vm1, %v5798_v25 }
 0x12b   : > { %4815 = vmatmul.mubr.msk.f32.gmra.mrb[30].mxu1 %vm222_vm1, %v6106_v60  ;;  %5038 = vmatmul.mubr.msk.f32.gmra.mrb[12].mxu0 %vm222_vm1, %v5807_v27 }
 0x12c   : > { %4843 = vmatprep.mubr.msk.f32.mxu1 %vm222_vm1, %v6587_v36  ;;  %5040 = vmatprep.mubr.msk.f32.mxu0 %vm222_vm1, %v5811_v29 }
 0x12f   : > { %4844 = vmatmul.mubr.msk.f32.vlgmr.msra.gmra.mrb[16].mxu1 %vm222_vm1, %v6589_v41  ;;  %5041 = vmatmul.mubr.msk.f32.gmra.mrb[14].mxu0 %vm222_vm1, %v5827_v33 }
 0x130   : > { %4846 = vmatprep.mubr.msk.f32.mxu1 %vm222_vm1, %v6591_v48  ;;  %5043 = vmatprep.mubr.msk.f32.mxu0 %vm222_vm1, %v5833_v39 }
 0x133   : > { %4847 = vmatmul.mubr.msk.f32.gmra.mrb[18].mxu1 %vm222_vm1, %v6593_v50  ;;  %5044 = vmatmul.mubr.msk.f32.gmra.mrb[16].mxu0 %vm222_vm1, %v5847_v40 }
 0x134   : > { %4849 = vmatprep.mubr.msk.f32.mxu1 %vm222_vm1, %v6595_v52  ;;  %5046 = vmatprep.mubr.msk.f32.mxu0 %vm222_vm1, %v5851_v44 }
 0x137   : > { %4850 = vmatmul.mubr.msk.f32.gmra.mrb[20].mxu1 %vm222_vm1, %v6597_v0  ;;  %5047 = vmatmul.mubr.msk.f32.gmra.mrb[18].mxu0 %vm222_vm1, %v5863_v46 }
 0x138   : > { %4852 = vmatprep.mubr.msk.f32.mxu1 %vm222_vm1, %v6599_v2  ;;  %5049 = vmatprep.mubr.msk.f32.mxu0 %vm222_vm1, %v5867_v57 }
 0x13b   : > { %4853 = vmatmul.mubr.msk.f32.gmra.mrb[22].mxu1 %vm222_vm1, %v6601_v16  ;;  %5050 = vmatmul.mubr.msk.f32.gmra.mrb[20].mxu0 %vm222_vm1, %v5879_v24 }
 0x13c   : > { %4855 = vmatprep.mubr.msk.f32.mxu1 %vm222_vm1, %v6603_v35  ;;  %5052 = vmatprep.mubr.msk.f32.mxu0 %vm222_vm1, %v5883_v22  ;;  %v6385_v22 = vld [vmem:[%s6505_s2] ss:$0 sm:$0xff] }
 0x13f   : > { %4856 = vmatmul.mubr.msk.f32.gmra.mrb[24].mxu1 %vm222_vm1, %v6605_v43  ;;  %5053 = vmatmul.mubr.msk.f32.gmra.mrb[22].mxu0 %vm222_vm1, %v5895_v18 }
 0x140   : > { %4858 = vmatprep.mubr.msk.f32.mxu1 %vm222_vm1, %v6607_v51  ;;  %5055 = vmatprep.mubr.msk.f32.mxu0 %vm222_vm1, %v5899_v14 }
 0x143   : > { %4859 = vmatmul.mubr.msk.f32.gmra.mrb[26].mxu1 %vm222_vm1, %v6609_v30  ;;  %5056 = vmatmul.mubr.msk.f32.gmra.mrb[24].mxu0 %vm222_vm1, %v5911_v10 }
 0x144   : > { %4861 = vmatprep.mubr.msk.f32.mxu1 %vm222_vm1, %v6610_v3  ;;  %5058 = vmatprep.mubr.msk.f32.mxu0 %vm222_vm1, %v5915_v5 }
 0x147   : > { %4862 = vmatmul.mubr.msk.f32.gmra.mrb[28].mxu1 %vm222_vm1, %v6612_v49  ;;  %5059 = vmatmul.mubr.msk.f32.gmra.mrb[26].mxu0 %vm222_vm1, %v6584_v32 }
 0x148   : > { %4864 = vmatprep.mubr.msk.f32.mxu1 %vm222_vm1, %v6230_v34  ;;  %5061 = vmatprep.mubr.msk.f32.mxu0 %vm222_vm1, %v6613_v54 }
 0x14b   : > { %4865 = vmatmul.mubr.msk.f32.gmra.mrb[30].mxu1 %vm222_vm1, %v6240_v53  ;;  %5062 = vmatmul.mubr.msk.f32.gmra.mrb[28].mxu0 %vm222_vm1, %v6614_v59 }
 0x14c   : > { %5064 = vmatprep.mubr.msk.f32.mxu0 %vm222_vm1, %v3430_v56 }
 0x14f   : > { %5065 = vmatmul.mubr.msk.f32.gmra.mrb[30].mxu0 %vm222_vm1, %v3431_v61 }
 0x1c2   : > { %v4771_v62 = vpop.f32.mrb[0].mxu1 }
 0x1c3   : > { %v1648_v1 = vpop.f32.mrb[1].mxu1 }
 0x1c6   : > { %v4774_v4 = vpop.f32.mrb[2].mxu1 }
 0x1c7   : > { %v1658_v5 = vpop.f32.mrb[3].mxu1 }
 0x1ca   : > { %v4777_v6 = vpop.f32.mrb[4].mxu1 }
 0x1cb   : > { %v1668_v9 = vpop.f32.mrb[5].mxu1 }
 0x1ce   : > { %v4780_v10 = vpop.f32.mrb[6].mxu1 }
 0x1cf   : > { %v1678_v11 = vpop.f32.mrb[7].mxu1 }
 0x1d2   : > { %v4783_v12 = vpop.f32.mrb[8].mxu1 }
 0x1d3   : > { %v1688_v13 = vpop.f32.mrb[9].mxu1 }
 0x1d6   : > { %v4786_v14 = vpop.f32.mrb[10].mxu1 }
 0x1d7   : > { %v1698_v15 = vpop.f32.mrb[11].mxu1 }
 0x1da   : > { %v6374_v17 = vpop.f32.mrb[12].mxu1 }
 0x1db   : > { %v6376_v18 = vpop.f32.mrb[13].mxu1 }
 0x1de   : > { %v6378_v19 = vpop.f32.mrb[14].mxu1 }
 0x1df   : > { %v6380_v20 = vpop.f32.mrb[15].mxu1 }
 0x1e6   : > { %v5021_v21 = vpop.f32.mrb[0].mxu0 }
 0x1e7   : > { %v5069_v23 = vadd.f32 %v5021_v21, %v4771_v62  ;;  %v3599_v25 = vpop.f32.mrb[1].mxu0 }
 0x1e8   : > { %v5070_v27 = vadd.f32 %v3599_v25, %v1648_v1 }
 0x1e9   : > { %v3798_v28 = vadd.f32 %v5069_v23, %v6385_v22 }
 0x1ea   : > { %v3797_v29 = vadd.f32 %v5070_v27, %v6385_v22  ;;  %v5024_v31 = vpop.f32.mrb[2].mxu0 }
 0x1eb   : > { %v3830_v33 = vmax.f32 %v3798_v28, 0.0  ;;  %v5071_v38 = vadd.f32 %v5024_v31, %v4774_v4  ;;  %v3609_v39 = vpop.f32.mrb[3].mxu0 }
 0x1ec   : > { %v3829_v8 = vmax.f32 %v3797_v29, 0.0  ;;  %v5072_v40 = vadd.f32 %v3609_v39, %v1658_v5 }
 0x1ed   : > { %3863 = vst.msk [vmem:[%s6393_s19 + $0x8] sm:$0xff] %vm3861_vm3, %v3830_v33  ;;  %v3800_v42 = vadd.f32 %v5071_v38, %v6385_v22 }
 0x1ee   : > { %3862 = vst.msk [vmem:[%s6393_s19] sm:$0xff] %vm3861_vm3, %v3829_v8  ;;  %v3799_v44 = vadd.f32 %v5072_v40, %v6385_v22  ;;  %v5027_v45 = vpop.f32.mrb[4].mxu0 }
 0x1ef   : > { %v3832_v46 = vmax.f32 %v3800_v42, 0.0  ;;  %v5073_v47 = vadd.f32 %v5027_v45, %v4777_v6  ;;  %v3619_v57 = vpop.f32.mrb[5].mxu0 }
 0x1f0   : > { %v3831_v58 = vmax.f32 %v3799_v44, 0.0  ;;  %v5074_v24 = vadd.f32 %v3619_v57, %v1668_v9 }
 0x1f1   : > { %3865 = vst.msk [vmem:[%s6393_s19 + $0x18] sm:$0xff] %vm3861_vm3, %v3832_v46  ;;  %v3802_v26 = vadd.f32 %v5073_v47, %v6385_v22 }
 0x1f2   : > { %3864 = vst.msk [vmem:[%s6393_s19 + $0x10] sm:$0xff] %vm3861_vm3, %v3831_v58  ;;  %v3801_v63 = vadd.f32 %v5074_v24, %v6385_v22  ;;  %v5030_v55 = vpop.f32.mrb[6].mxu0 }
 0x1f3   : > { %v3834_v60 = vmax.f32 %v3802_v26, 0.0  ;;  %v5075_v32 = vadd.f32 %v5030_v55, %v4780_v10  ;;  %v3629_v36 = vpop.f32.mrb[7].mxu0 }
 0x1f4   : > { %v3833_v41 = vmax.f32 %v3801_v63, 0.0  ;;  %v5076_v48 = vadd.f32 %v3629_v36, %v1678_v11 }
 0x1f5   : > { %3867 = vst.msk [vmem:[%s6393_s19 + $0x28] sm:$0xff] %vm3861_vm3, %v3834_v60  ;;  %v3804_v50 = vadd.f32 %v5075_v32, %v6385_v22 }
 0x1f6   : > { %3866 = vst.msk [vmem:[%s6393_s19 + $0x20] sm:$0xff] %vm3861_vm3, %v3833_v41  ;;  %v3803_v52 = vadd.f32 %v5076_v48, %v6385_v22  ;;  %v5033_v0 = vpop.f32.mrb[8].mxu0 }
 0x1f7   : > { %v3836_v2 = vmax.f32 %v3804_v50, 0.0  ;;  %v5077_v16 = vadd.f32 %v5033_v0, %v4783_v12  ;;  %v3639_v35 = vpop.f32.mrb[9].mxu0 }
 0x1f8   : > { %v3835_v43 = vmax.f32 %v3803_v52, 0.0  ;;  %v5078_v51 = vadd.f32 %v3639_v35, %v1688_v13 }
 0x1f9   : > { %3869 = vst.msk [vmem:[%s6393_s19 + $0x38] sm:$0xff] %vm3861_vm3, %v3836_v2  ;;  %v3806_v30 = vadd.f32 %v5077_v16, %v6385_v22 }
 0x1fa   : > { %3868 = vst.msk [vmem:[%s6393_s19 + $0x30] sm:$0xff] %vm3861_vm3, %v3835_v43  ;;  %v3805_v3 = vadd.f32 %v5078_v51, %v6385_v22  ;;  %v5036_v34 = vpop.f32.mrb[10].mxu0 }
 0x1fb   : > { %v3838_v49 = vmax.f32 %v3806_v30, 0.0  ;;  %v5079_v53 = vadd.f32 %v5036_v34, %v4786_v14  ;;  %v3649_v7 = vpop.f32.mrb[11].mxu0 }
 0x1fc   : > { %v3837_v37 = vmax.f32 %v3805_v3, 0.0  ;;  %v5080_v54 = vadd.f32 %v3649_v7, %v1698_v15 }
 0x1fd   : > { %3871 = vst.msk [vmem:[%s6393_s19 + $0x48] sm:$0xff] %vm3861_vm3, %v3838_v49  ;;  %v3808_v56 = vadd.f32 %v5079_v53, %v6385_v22 }
 0x1fe   : > { %3870 = vst.msk [vmem:[%s6393_s19 + $0x40] sm:$0xff] %vm3861_vm3, %v3837_v37  ;;  %v3807_v59 = vadd.f32 %v5080_v54, %v6385_v22  ;;  %v5039_v61 = vpop.f32.mrb[12].mxu0 }
 0x1ff   : > { %v3840_v62 = vmax.f32 %v3808_v56, 0.0  ;;  %v5081_v1 = vadd.f32 %v5039_v61, %v6374_v17  ;;  %v3659_v4 = vpop.f32.mrb[13].mxu0 }
 0x200   : > { %v3839_v5 = vmax.f32 %v3807_v59, 0.0  ;;  %v5082_v6 = vadd.f32 %v3659_v4, %v6376_v18 }
 0x201   : > { %3873 = vst.msk [vmem:[%s6393_s19 + $0x58] sm:$0xff] %vm3861_vm3, %v3840_v62  ;;  %v3810_v9 = vadd.f32 %v5081_v1, %v6385_v22 }
 0x202   : > { %3872 = vst.msk [vmem:[%s6393_s19 + $0x50] sm:$0xff] %vm3861_vm3, %v3839_v5  ;;  %v3809_v10 = vadd.f32 %v5082_v6, %v6385_v22  ;;  %v4845_v11 = vpop.f32.mrb[16].mxu1  ;;  %v5042_v12 = vpop.f32.mrb[14].mxu0 }
 0x203   : > { %v3842_v13 = vmax.f32 %v3810_v9, 0.0  ;;  %v5083_v14 = vadd.f32 %v5042_v12, %v6378_v19  ;;  %v2118_v15 = vpop.f32.mrb[17].mxu1  ;;  %v3669_v17 = vpop.f32.mrb[15].mxu0 }
 0x204   : > { %v3841_v21 = vmax.f32 %v3809_v10, 0.0  ;;  %v5084_v18 = vadd.f32 %v3669_v17, %v6380_v20 }
 0x205   : > { %3875 = vst.msk [vmem:[%s6393_s19 + $0x68] sm:$0xff] %vm3861_vm3, %v3842_v13  ;;  %v3812_v23 = vadd.f32 %v5083_v14, %v6385_v22 }
 0x206   : > { %3874 = vst.msk [vmem:[%s6393_s19 + $0x60] sm:$0xff] %vm3861_vm3, %v3841_v21  ;;  %v3811_v25 = vadd.f32 %v5084_v18, %v6385_v22  ;;  %v4848_v27 = vpop.f32.mrb[18].mxu1  ;;  %v5045_v28 = vpop.f32.mrb[16].mxu0 }
 0x207   : > { %v3844_v29 = vmax.f32 %v3812_v23, 0.0  ;;  %v5085_v31 = vadd.f32 %v5045_v28, %v4845_v11  ;;  %v2128_v19 = vpop.f32.mrb[19].mxu1  ;;  %v3679_v33 = vpop.f32.mrb[17].mxu0 }
 0x208   : > { %v3843_v38 = vmax.f32 %v3811_v25, 0.0  ;;  %v5086_v39 = vadd.f32 %v3679_v33, %v2118_v15 }
 0x209   : > { %3877 = vst.msk [vmem:[%s6393_s19 + $0x78] sm:$0xff] %vm3861_vm3, %v3844_v29  ;;  %v3814_v20 = vadd.f32 %v5085_v31, %v6385_v22 }
 0x20a   : > { %3876 = vst.msk [vmem:[%s6393_s19 + $0x70] sm:$0xff] %vm3861_vm3, %v3843_v38  ;;  %v3813_v8 = vadd.f32 %v5086_v39, %v6385_v22  ;;  %v4851_v40 = vpop.f32.mrb[20].mxu1  ;;  %v5048_v42 = vpop.f32.mrb[18].mxu0 }
 0x20b   : > { %v3846_v44 = vmax.f32 %v3814_v20, 0.0  ;;  %v5087_v45 = vadd.f32 %v5048_v42, %v4848_v27  ;;  %v2138_v46 = vpop.f32.mrb[21].mxu1  ;;  %v3689_v47 = vpop.f32.mrb[19].mxu0 }
 0x20c   : > { %v3845_v57 = vmax.f32 %v3813_v8, 0.0  ;;  %v5088_v58 = vadd.f32 %v3689_v47, %v2128_v19 }
 0x20d   : > { %3879 = vst.msk [vmem:[%s6393_s19 + $0x88] sm:$0xff] %vm3861_vm3, %v3846_v44  ;;  %v3816_v24 = vadd.f32 %v5087_v45, %v6385_v22 }
 0x20e   : > { %3878 = vst.msk [vmem:[%s6393_s19 + $0x80] sm:$0xff] %vm3861_vm3, %v3845_v57  ;;  %v3815_v26 = vadd.f32 %v5088_v58, %v6385_v22  ;;  %v4854_v63 = vpop.f32.mrb[22].mxu1  ;;  %v5051_v55 = vpop.f32.mrb[20].mxu0 }
 0x20f   : > { %v3848_v60 = vmax.f32 %v3816_v24, 0.0  ;;  %v5089_v32 = vadd.f32 %v5051_v55, %v4851_v40  ;;  %v2148_v36 = vpop.f32.mrb[23].mxu1  ;;  %v3699_v41 = vpop.f32.mrb[21].mxu0 }
 0x210   : > { %v3847_v48 = vmax.f32 %v3815_v26, 0.0  ;;  %v5090_v50 = vadd.f32 %v3699_v41, %v2138_v46 }
 0x211   : > { %3881 = vst.msk [vmem:[%s6393_s19 + $0x98] sm:$0xff] %vm3861_vm3, %v3848_v60  ;;  %v3818_v52 = vadd.f32 %v5089_v32, %v6385_v22 }
 0x212   : > { %3880 = vst.msk [vmem:[%s6393_s19 + $0x90] sm:$0xff] %vm3861_vm3, %v3847_v48  ;;  %v3817_v0 = vadd.f32 %v5090_v50, %v6385_v22  ;;  %v4857_v2 = vpop.f32.mrb[24].mxu1  ;;  %v5054_v16 = vpop.f32.mrb[22].mxu0 }
 0x213   : > { %v3850_v35 = vmax.f32 %v3818_v52, 0.0  ;;  %v5091_v43 = vadd.f32 %v5054_v16, %v4854_v63  ;;  %v2158_v51 = vpop.f32.mrb[25].mxu1  ;;  %v3709_v30 = vpop.f32.mrb[23].mxu0 }
 0x214   : > { %v3849_v3 = vmax.f32 %v3817_v0, 0.0  ;;  %v5092_v34 = vadd.f32 %v3709_v30, %v2148_v36 }
 0x215   : > { %3883 = vst.msk [vmem:[%s6393_s19 + $0xa8] sm:$0xff] %vm3861_vm3, %v3850_v35  ;;  %v3820_v49 = vadd.f32 %v5091_v43, %v6385_v22 }
 0x216   : > { %3882 = vst.msk [vmem:[%s6393_s19 + $0xa0] sm:$0xff] %vm3861_vm3, %v3849_v3  ;;  %v3819_v53 = vadd.f32 %v5092_v34, %v6385_v22  ;;  %v4860_v7 = vpop.f32.mrb[26].mxu1  ;;  %v5057_v37 = vpop.f32.mrb[24].mxu0 }
 0x217   : > { %v3852_v54 = vmax.f32 %v3820_v49, 0.0  ;;  %v5093_v56 = vadd.f32 %v5057_v37, %v4857_v2  ;;  %v2168_v59 = vpop.f32.mrb[27].mxu1  ;;  %v3719_v61 = vpop.f32.mrb[25].mxu0 }
 0x218   : > { %v3851_v62 = vmax.f32 %v3819_v53, 0.0  ;;  %v5094_v1 = vadd.f32 %v3719_v61, %v2158_v51 }
 0x219   : > { %3885 = vst.msk [vmem:[%s6393_s19 + $0xb8] sm:$0xff] %vm3861_vm3, %v3852_v54  ;;  %v3822_v4 = vadd.f32 %v5093_v56, %v6385_v22 }
 0x21a   : > { %3884 = vst.msk [vmem:[%s6393_s19 + $0xb0] sm:$0xff] %vm3861_vm3, %v3851_v62  ;;  %v3821_v5 = vadd.f32 %v5094_v1, %v6385_v22  ;;  %v4863_v6 = vpop.f32.mrb[28].mxu1  ;;  %v5060_v9 = vpop.f32.mrb[26].mxu0 }
 0x21b   : > { %v3854_v10 = vmax.f32 %v3822_v4, 0.0  ;;  %v5095_v11 = vadd.f32 %v5060_v9, %v4860_v7  ;;  %v2178_v12 = vpop.f32.mrb[29].mxu1  ;;  %v3729_v13 = vpop.f32.mrb[27].mxu0 }
 0x21c   : > { %v3853_v14 = vmax.f32 %v3821_v5, 0.0  ;;  %v5096_v15 = vadd.f32 %v3729_v13, %v2168_v59 }
 0x21d   : > { %3887 = vst.msk [vmem:[%s6393_s19 + $0xc8] sm:$0xff] %vm3861_vm3, %v3854_v10  ;;  %v3824_v17 = vadd.f32 %v5095_v11, %v6385_v22 }
 0x21e   : > { %3886 = vst.msk [vmem:[%s6393_s19 + $0xc0] sm:$0xff] %vm3861_vm3, %v3853_v14  ;;  %v3823_v21 = vadd.f32 %v5096_v15, %v6385_v22  ;;  %v4866_v18 = vpop.f32.mrb[30].mxu1  ;;  %v5063_v23 = vpop.f32.mrb[28].mxu0 }
 0x21f   : > { %v3856_v25 = vmax.f32 %v3824_v17, 0.0  ;;  %v5097_v27 = vadd.f32 %v5063_v23, %v4863_v6  ;;  %v2188_v28 = vpop.f32.mrb[31].mxu1  ;;  %v3739_v29 = vpop.f32.mrb[29].mxu0 }
 0x220   : > { %v3855_v31 = vmax.f32 %v3823_v21, 0.0  ;;  %v5098_v19 = vadd.f32 %v3739_v29, %v2178_v12 }
 0x221   : > { %3889 = vst.msk [vmem:[%s6393_s19 + $0xd8] sm:$0xff] %vm3861_vm3, %v3856_v25  ;;  %v3826_v33 = vadd.f32 %v5097_v27, %v6385_v22 }
 0x222   : > { %3888 = vst.msk [vmem:[%s6393_s19 + $0xd0] sm:$0xff] %vm3861_vm3, %v3855_v31  ;;  %v3825_v38 = vadd.f32 %v5098_v19, %v6385_v22  ;;  %v5066_v39 = vpop.f32.mrb[30].mxu0 }
 0x223   : > { %v3858_v20 = vmax.f32 %v3826_v33, 0.0  ;;  %v5099_v8 = vadd.f32 %v5066_v39, %v4866_v18  ;;  %v3749_v40 = vpop.f32.mrb[31].mxu0 }
 0x224   : > { %v3857_v42 = vmax.f32 %v3825_v38, 0.0  ;;  %v5100_v44 = vadd.f32 %v3749_v40, %v2188_v28 }
 0x225   : > { %3891 = vst.msk [vmem:[%s6393_s19 + $0xe8] sm:$0xff] %vm3861_vm3, %v3858_v20  ;;  %v3828_v45 = vadd.f32 %v5099_v8, %v6385_v22 }
 0x226   : > { %3890 = vst.msk [vmem:[%s6393_s19 + $0xe0] sm:$0xff] %vm3861_vm3, %v3857_v42  ;;  %v3827_v46 = vadd.f32 %v5100_v44, %v6385_v22 }
 0x227   : > { %v3860_v47 = vmax.f32 %v3828_v45, 0.0 }
 0x228   : > { %v3859_v57 = vmax.f32 %v3827_v46, 0.0 }
 0x229   : > { %3893 = vst.msk [vmem:[%s6393_s19 + $0xf8] sm:$0xff] %vm3861_vm3, %v3860_v47 }
 0x22a   : > { %3892 = vst.msk [vmem:[%s6393_s19 + $0xf0] sm:$0xff] %vm3861_vm3, %v3859_v57 }
 0x22b PF: > { %s13_s14 = sadd.s32 1, %s5372_s14   ;;  %s6615_s12 = smov %s5368_s13 }
 0x22c   : > { %p10_p5 = scmp.ge.s32.totalorder %s13_s14, 4   ;;  %s6616_s13 = smov %s6618_s15 }
 0x22e   :  { %12 = sbr.rel (!%p10_p5) target bundleno = 2 (0x2), region = 78 }

</bundles_post_ra>
